<compile_context>
chip_gen: v6e
topology: v6e:2x2x1
jax: 0.10.0
libtpu: 0.0.40
codegen_flags: <defaults>
</compile_context>

<pallas_src>
import functools

import jax
import jax.numpy as jnp
from jax import lax
from jax.experimental import pallas as pl
from jax.experimental.pallas import tpu as pltpu


# ----------------------------------------------------------------------------
# Pallas kernel: fused 3x3 conv (9 shifted MXU dots) + folded affine + act.
# ----------------------------------------------------------------------------
def _conv_relu_kernel(x_ref, w_ref, shift_ref, o_ref, *,
                      th, wd, cin, negative_slope):
    """One (image, row-band) tile.

    x_ref:     (th+2, wd+2, cin)  padded input band (1-row/1-col halo each side)
    w_ref:     (9, cin, coutp)    conv weights, BN scale folded in (resident)
    shift_ref: (1, coutp)         folded bias / BN shift (f32)
    o_ref:     (th, wd, coutp)    output band (lane-dense coutp)
    """
    coutp = o_ref.shape[-1]
    acc = jnp.zeros((th * wd, coutp), jnp.float32)
    # Nine taps of the 3x3 stencil: shifted window, contract over Cin on the
    # MXU, accumulate in f32.  Static unroll (9 iterations).
    for kh in range(3):
        for kw in range(3):
            xs = x_ref[pl.ds(kh, th), pl.ds(kw, wd), :]        # (th, wd, cin)
            xs = xs.reshape(th * wd, cin)
            acc = acc + jnp.dot(xs, w_ref[kh * 3 + kw],
                                preferred_element_type=jnp.float32)
    y = acc + shift_ref[...]                                   # folded bias/BN
    if negative_slope > 0.0:
        y = jnp.where(y > 0.0, y, negative_slope * y)
    else:
        y = jnp.maximum(y, 0.0)
    o_ref[...] = y.reshape(th, wd, coutp).astype(o_ref.dtype)


# ----------------------------------------------------------------------------
# Wrapper: layout glue (NCHW->NHWC, halo bands), weight folding, pallas_call.
# ----------------------------------------------------------------------------
def conv_relu_forward(x_nchw, weight, bias, *,
                      use_bn: bool = False,
                      bn_gamma=None, bn_beta=None,
                      bn_mean=None, bn_var=None, bn_eps: float = 1e-5,
                      leaky_relu: bool = False,
                      compute_dtype=None,
                      row_tile=None,
                      out_layout: str = "NCHW"):
    """ConvRelu forward. x_nchw: (N, Cin, H, W). weight: (Cout, Cin, 3, 3)."""
    N, Cin, H, W = x_nchw.shape
    Cout, Cin_w, KH, KW = weight.shape
    assert Cin_w == Cin and KH == 3 and KW == 3, \
        "kernel implements the ConvRelu default config (kernel=3, stride=1, padding=1)"

    cdt = compute_dtype if compute_dtype is not None else x_nchw.dtype

    # ---- fold bias + eval-mode BatchNorm into the weights / one shift ----
    # (Cout, Cin, 3, 3) -> (3, 3, Cin, Cout) -> (9, Cin, Cout)
    w_kio = jnp.transpose(weight, (2, 3, 1, 0)).reshape(9, Cin, Cout)
    w_kio = w_kio.astype(jnp.float32)
    b_f32 = bias.astype(jnp.float32)
    if use_bn:
        inv_std = 1.0 / jnp.sqrt(bn_var.astype(jnp.float32) + bn_eps)
        scale = bn_gamma.astype(jnp.float32) * inv_std
        shift = bn_beta.astype(jnp.float32) + (b_f32 - bn_mean.astype(jnp.float32)) * scale
        w_kio = w_kio * scale[None, None, :]
    else:
        shift = b_f32

    # ---- lane-dense Cout: pad to a multiple of 128 ----
    Coutp = ((Cout + 127) // 128) * 128
    if Coutp != Cout:
        w_kio = jnp.pad(w_kio, ((0, 0), (0, 0), (0, Coutp - Cout)))
        shift = jnp.pad(shift, (0, Coutp - Cout))
    w_k = w_kio.astype(cdt)                      # (9, Cin, Coutp)
    shift_row = shift.reshape(1, Coutp)          # f32

    # ---- choose row-band size TH against a VMEM budget ----
    if row_tile is None:
        # keep the f32 accumulator / output band around ~2 MiB
        budget_rows = max(8, (2 * 1024 * 1024) // max(1, W * Coutp * 4))
        row_tile = budget_rows
    TH = max(1, min(int(row_tile), H))
    HB = -(-H // TH)          # ceil
    Hb = HB * TH

    # ---- NCHW -> NHWC, spatial pad, build halo'd row bands ----
    # Bands overlap by 2 rows only: ~(TH+2)/TH HBM read amplification instead
    # of the 9x patch-matrix expansion.
    x = jnp.transpose(x_nchw, (0, 2, 3, 1)).astype(cdt)            # (N, H, W, Cin)
    xp = jnp.pad(x, ((0, 0), (1, 1 + Hb - H), (1, 1), (0, 0)))     # (N, Hb+2, W+2, Cin)
    bands = jnp.stack([xp[:, i * TH: i * TH + TH + 2] for i in range(HB)],
                      axis=1)                                      # (N, HB, TH+2, W+2, Cin)

    kernel = functools.partial(
        _conv_relu_kernel, th=TH, wd=W, cin=Cin,
        negative_slope=0.2 if leaky_relu else 0.0)

    out = pl.pallas_call(
        kernel,
        out_shape=jax.ShapeDtypeStruct((N, Hb, W, Coutp), x_nchw.dtype),
        grid_spec=pltpu.PrefetchScalarGridSpec(
            num_scalar_prefetch=0,
            grid=(N, HB),
            in_specs=[
                # input band with halo (squeeze N / band dims)
                pl.BlockSpec((None, None, TH + 2, W + 2, Cin),
                             lambda n, i: (n, i, 0, 0, 0)),
                # folded weights, resident across the whole grid
                pl.BlockSpec((9, Cin, Coutp), lambda n, i: (0, 0, 0)),
                # folded bias / BN shift
                pl.BlockSpec((1, Coutp), lambda n, i: (0, 0)),
            ],
            out_specs=pl.BlockSpec((None, TH, W, Coutp),
                                   lambda n, i: (n, i, 0, 0)),
        ),
        compiler_params=pltpu.CompilerParams(
            dimension_semantics=("parallel", "parallel"),
            vmem_limit_bytes=32 * 1024 * 1024),
    )(bands, w_k, shift_row)

    out = out[:, :H, :, :Cout]                   # strip H padding + Cout lanes
    if out_layout == "NHWC":
        return out                               # cheaper for NHWC consumers
    return jnp.transpose(out, (0, 3, 1, 2))      # match PyTorch NCHW

    # TODO(synk): training-mode Dropout(p=0.2) not implemented (eval = identity).
    # TODO(synk): for very wide layers (large Cin*Cout) add K/Cout grid axes so
    #             the (9, Cin, Coutp) weight block is not held resident.


# ----------------------------------------------------------------------------
# Main
# ----------------------------------------------------------------------------
if __name__ == "__main__":
    key = jax.random.PRNGKey(0)
    k_x, k_w, k_b, k_g, k_be, k_m, k_v = jax.random.split(key, 7)

    N, Cin, H, W = 2, 4, 16, 16
    Cout, KH, KW = 8, 3, 3

    x = jax.random.normal(k_x, (N, Cin, H, W), jnp.float32)
    fan_in = Cin * KH * KW
    bound = 1.0 / (fan_in ** 0.5)
    weight = jax.random.uniform(k_w, (Cout, Cin, KH, KW), jnp.float32, -bound, bound)
    bias = jax.random.uniform(k_b, (Cout,), jnp.float32, -bound, bound)

    # Pure-JAX reference (conv + bias), shared by all checks.
    pre = lax.conv_general_dilated(
        x, weight, window_strides=(1, 1), padding=((1, 1), (1, 1)),
        dimension_numbers=("NCHW", "OIHW", "NCHW")) + bias[None, :, None, None]
    ref_relu = jnp.maximum(pre, 0.0)

    # 1) default config (use_bn=False, leaky_relu=False), f32 streams.
    y = jax.block_until_ready(conv_relu_forward(x, weight, bias))
    assert y.shape == (N, Cout, H, W)
    assert jnp.allclose(y, ref_relu, atol=1e-4, rtol=1e-4)

    # 2) bf16 input/weight streams (mem-bound path), f32 MXU accumulation.
    y_bf16 = jax.block_until_ready(
        conv_relu_forward(x, weight, bias, compute_dtype=jnp.bfloat16))
    assert jnp.allclose(y_bf16, ref_relu, atol=1e-1, rtol=1e-1)

    # 3) leaky_relu=True (module hardcodes negative_slope=0.2).
    y_leaky = jax.block_until_ready(
        conv_relu_forward(x, weight, bias, leaky_relu=True))
    ref_leaky = jnp.where(pre > 0.0, pre, 0.2 * pre)
    assert jnp.allclose(y_leaky, ref_leaky, atol=1e-4, rtol=1e-4)

    # 4) use_bn=True (eval-mode BN folded into weights / shift).
    gamma = jax.random.uniform(k_g, (Cout,), jnp.float32, 0.5, 1.5)
    beta = 0.1 * jax.random.normal(k_be, (Cout,), jnp.float32)
    mean = 0.1 * jax.random.normal(k_m, (Cout,), jnp.float32)
    var = jax.random.uniform(k_v, (Cout,), jnp.float32, 0.5, 1.5)
    y_bn = jax.block_until_ready(conv_relu_forward(
        x, weight, bias, use_bn=True, bn_gamma=gamma, bn_beta=beta,
        bn_mean=mean, bn_var=var))
    scale = gamma / jnp.sqrt(var + 1e-5)
    ref_bn = jnp.maximum(
        (pre - mean[None, :, None, None]) * scale[None, :, None, None]
        + beta[None, :, None, None], 0.0)
    assert jnp.allclose(y_bn, ref_bn, atol=1e-4, rtol=1e-4)

    print("KERNEL_OK")
</pallas_src>

<mosaic_0001>
module attributes {stable_mosaic.version = 11 : i64} {
  func.func @_conv_relu_kernel(%arg0: i32, %arg1: i32, %arg2: memref<1x1x18x18x4xf32, #tpu.memory_space<vmem>>, %arg3: memref<9x4x128xf32, #tpu.memory_space<vmem>>, %arg4: memref<1x128xf32, #tpu.memory_space<vmem>>, %arg5: memref<1x16x16x128xf32, #tpu.memory_space<vmem>>) attributes {dimension_semantics = [#tpu.dimension_semantics<parallel>, #tpu.dimension_semantics<parallel>], iteration_bounds = array<i64: 2, 1>, scalar_prefetch = 0 : i64, scratch_operands = 0 : i64, tpu.core_type = #tpu.core_type<tc>, window_params = [{transform_indices = @transform_0, window_bounds = array<i64: 1, 1, 18, 18, 4>}, {pipeline_mode = #tpu.pipeline_mode<synchronous>, transform_indices = @transform_1, window_bounds = array<i64: 9, 4, 128>}, {pipeline_mode = #tpu.pipeline_mode<synchronous>, transform_indices = @transform_2, window_bounds = array<i64: 1, 128>}, {transform_indices = @transform_3, window_bounds = array<i64: 1, 16, 16, 128>}]} {
    %cst = arith.constant 0.000000e+00 : f32
    %0 = vector.broadcast %cst : f32 to vector<256x128xf32>
    %c0 = arith.constant 0 : index
    %c0_0 = arith.constant 0 : index
    %c0_1 = arith.constant 0 : index
    %c0_2 = arith.constant 0 : index
    %c0_3 = arith.constant 0 : index
    %1 = vector.load %arg2[%c0, %c0_0, %c0_1, %c0_2, %c0_3] : memref<1x1x18x18x4xf32, #tpu.memory_space<vmem>>, vector<1x1x16x16x4xf32>
    %2 = vector.shape_cast %1 : vector<1x1x16x16x4xf32> to vector<16x16x4xf32>
    %3 = vector.shape_cast %2 : vector<16x16x4xf32> to vector<256x4xf32>
    %c0_4 = arith.constant 0 : index
    %c0_5 = arith.constant 0 : index
    %c0_6 = arith.constant 0 : index
    %4 = vector.load %arg3[%c0_4, %c0_5, %c0_6] : memref<9x4x128xf32, #tpu.memory_space<vmem>>, vector<1x4x128xf32>
    %5 = vector.shape_cast %4 : vector<1x4x128xf32> to vector<4x128xf32>
    %cst_7 = arith.constant dense<0.000000e+00> : vector<256x128xf32>
    %6 = tpu.matmul %3, %5, %cst_7 {dimension_numbers = #tpu.dot_dimension_numbers<[1], [0], [0], [1], [0, 0, 1, 1], [], []>} : vector<256x4xf32>, vector<4x128xf32>, vector<256x128xf32> -> vector<256x128xf32>
    %7 = arith.addf %0, %6 : vector<256x128xf32>
    %c0_8 = arith.constant 0 : index
    %c0_9 = arith.constant 0 : index
    %c0_10 = arith.constant 0 : index
    %c1 = arith.constant 1 : index
    %c0_11 = arith.constant 0 : index
    %8 = vector.load %arg2[%c0_8, %c0_9, %c0_10, %c1, %c0_11] : memref<1x1x18x18x4xf32, #tpu.memory_space<vmem>>, vector<1x1x16x16x4xf32>
    %9 = vector.shape_cast %8 : vector<1x1x16x16x4xf32> to vector<16x16x4xf32>
    %10 = vector.shape_cast %9 : vector<16x16x4xf32> to vector<256x4xf32>
    %c1_12 = arith.constant 1 : index
    %c0_13 = arith.constant 0 : index
    %c0_14 = arith.constant 0 : index
    %11 = vector.load %arg3[%c1_12, %c0_13, %c0_14] : memref<9x4x128xf32, #tpu.memory_space<vmem>>, vector<1x4x128xf32>
    %12 = vector.shape_cast %11 : vector<1x4x128xf32> to vector<4x128xf32>
    %cst_15 = arith.constant dense<0.000000e+00> : vector<256x128xf32>
    %13 = tpu.matmul %10, %12, %cst_15 {dimension_numbers = #tpu.dot_dimension_numbers<[1], [0], [0], [1], [0, 0, 1, 1], [], []>} : vector<256x4xf32>, vector<4x128xf32>, vector<256x128xf32> -> vector<256x128xf32>
    %14 = arith.addf %7, %13 : vector<256x128xf32>
    %c0_16 = arith.constant 0 : index
    %c0_17 = arith.constant 0 : index
    %c0_18 = arith.constant 0 : index
    %c2 = arith.constant 2 : index
    %c0_19 = arith.constant 0 : index
    %15 = vector.load %arg2[%c0_16, %c0_17, %c0_18, %c2, %c0_19] : memref<1x1x18x18x4xf32, #tpu.memory_space<vmem>>, vector<1x1x16x16x4xf32>
    %16 = vector.shape_cast %15 : vector<1x1x16x16x4xf32> to vector<16x16x4xf32>
    %17 = vector.shape_cast %16 : vector<16x16x4xf32> to vector<256x4xf32>
    %c2_20 = arith.constant 2 : index
    %c0_21 = arith.constant 0 : index
    %c0_22 = arith.constant 0 : index
    %18 = vector.load %arg3[%c2_20, %c0_21, %c0_22] : memref<9x4x128xf32, #tpu.memory_space<vmem>>, vector<1x4x128xf32>
    %19 = vector.shape_cast %18 : vector<1x4x128xf32> to vector<4x128xf32>
    %cst_23 = arith.constant dense<0.000000e+00> : vector<256x128xf32>
    %20 = tpu.matmul %17, %19, %cst_23 {dimension_numbers = #tpu.dot_dimension_numbers<[1], [0], [0], [1], [0, 0, 1, 1], [], []>} : vector<256x4xf32>, vector<4x128xf32>, vector<256x128xf32> -> vector<256x128xf32>
    %21 = arith.addf %14, %20 : vector<256x128xf32>
    %c0_24 = arith.constant 0 : index
    %c0_25 = arith.constant 0 : index
    %c1_26 = arith.constant 1 : index
    %c0_27 = arith.constant 0 : index
    %c0_28 = arith.constant 0 : index
    %22 = vector.load %arg2[%c0_24, %c0_25, %c1_26, %c0_27, %c0_28] : memref<1x1x18x18x4xf32, #tpu.memory_space<vmem>>, vector<1x1x16x16x4xf32>
    %23 = vector.shape_cast %22 : vector<1x1x16x16x4xf32> to vector<16x16x4xf32>
    %24 = vector.shape_cast %23 : vector<16x16x4xf32> to vector<256x4xf32>
    %c3 = arith.constant 3 : index
    %c0_29 = arith.constant 0 : index
    %c0_30 = arith.constant 0 : index
    %25 = vector.load %arg3[%c3, %c0_29, %c0_30] : memref<9x4x128xf32, #tpu.memory_space<vmem>>, vector<1x4x128xf32>
    %26 = vector.shape_cast %25 : vector<1x4x128xf32> to vector<4x128xf32>
    %cst_31 = arith.constant dense<0.000000e+00> : vector<256x128xf32>
    %27 = tpu.matmul %24, %26, %cst_31 {dimension_numbers = #tpu.dot_dimension_numbers<[1], [0], [0], [1], [0, 0, 1, 1], [], []>} : vector<256x4xf32>, vector<4x128xf32>, vector<256x128xf32> -> vector<256x128xf32>
    %28 = arith.addf %21, %27 : vector<256x128xf32>
    %c0_32 = arith.constant 0 : index
    %c0_33 = arith.constant 0 : index
    %c1_34 = arith.constant 1 : index
    %c1_35 = arith.constant 1 : index
    %c0_36 = arith.constant 0 : index
    %29 = vector.load %arg2[%c0_32, %c0_33, %c1_34, %c1_35, %c0_36] : memref<1x1x18x18x4xf32, #tpu.memory_space<vmem>>, vector<1x1x16x16x4xf32>
    %30 = vector.shape_cast %29 : vector<1x1x16x16x4xf32> to vector<16x16x4xf32>
    %31 = vector.shape_cast %30 : vector<16x16x4xf32> to vector<256x4xf32>
    %c4 = arith.constant 4 : index
    %c0_37 = arith.constant 0 : index
    %c0_38 = arith.constant 0 : index
    %32 = vector.load %arg3[%c4, %c0_37, %c0_38] : memref<9x4x128xf32, #tpu.memory_space<vmem>>, vector<1x4x128xf32>
    %33 = vector.shape_cast %32 : vector<1x4x128xf32> to vector<4x128xf32>
    %cst_39 = arith.constant dense<0.000000e+00> : vector<256x128xf32>
    %34 = tpu.matmul %31, %33, %cst_39 {dimension_numbers = #tpu.dot_dimension_numbers<[1], [0], [0], [1], [0, 0, 1, 1], [], []>} : vector<256x4xf32>, vector<4x128xf32>, vector<256x128xf32> -> vector<256x128xf32>
    %35 = arith.addf %28, %34 : vector<256x128xf32>
    %c0_40 = arith.constant 0 : index
    %c0_41 = arith.constant 0 : index
    %c1_42 = arith.constant 1 : index
    %c2_43 = arith.constant 2 : index
    %c0_44 = arith.constant 0 : index
    %36 = vector.load %arg2[%c0_40, %c0_41, %c1_42, %c2_43, %c0_44] : memref<1x1x18x18x4xf32, #tpu.memory_space<vmem>>, vector<1x1x16x16x4xf32>
    %37 = vector.shape_cast %36 : vector<1x1x16x16x4xf32> to vector<16x16x4xf32>
    %38 = vector.shape_cast %37 : vector<16x16x4xf32> to vector<256x4xf32>
    %c5 = arith.constant 5 : index
    %c0_45 = arith.constant 0 : index
    %c0_46 = arith.constant 0 : index
    %39 = vector.load %arg3[%c5, %c0_45, %c0_46] : memref<9x4x128xf32, #tpu.memory_space<vmem>>, vector<1x4x128xf32>
    %40 = vector.shape_cast %39 : vector<1x4x128xf32> to vector<4x128xf32>
    %cst_47 = arith.constant dense<0.000000e+00> : vector<256x128xf32>
    %41 = tpu.matmul %38, %40, %cst_47 {dimension_numbers = #tpu.dot_dimension_numbers<[1], [0], [0], [1], [0, 0, 1, 1], [], []>} : vector<256x4xf32>, vector<4x128xf32>, vector<256x128xf32> -> vector<256x128xf32>
    %42 = arith.addf %35, %41 : vector<256x128xf32>
    %c0_48 = arith.constant 0 : index
    %c0_49 = arith.constant 0 : index
    %c2_50 = arith.constant 2 : index
    %c0_51 = arith.constant 0 : index
    %c0_52 = arith.constant 0 : index
    %43 = vector.load %arg2[%c0_48, %c0_49, %c2_50, %c0_51, %c0_52] : memref<1x1x18x18x4xf32, #tpu.memory_space<vmem>>, vector<1x1x16x16x4xf32>
    %44 = vector.shape_cast %43 : vector<1x1x16x16x4xf32> to vector<16x16x4xf32>
    %45 = vector.shape_cast %44 : vector<16x16x4xf32> to vector<256x4xf32>
    %c6 = arith.constant 6 : index
    %c0_53 = arith.constant 0 : index
    %c0_54 = arith.constant 0 : index
    %46 = vector.load %arg3[%c6, %c0_53, %c0_54] : memref<9x4x128xf32, #tpu.memory_space<vmem>>, vector<1x4x128xf32>
    %47 = vector.shape_cast %46 : vector<1x4x128xf32> to vector<4x128xf32>
    %cst_55 = arith.constant dense<0.000000e+00> : vector<256x128xf32>
    %48 = tpu.matmul %45, %47, %cst_55 {dimension_numbers = #tpu.dot_dimension_numbers<[1], [0], [0], [1], [0, 0, 1, 1], [], []>} : vector<256x4xf32>, vector<4x128xf32>, vector<256x128xf32> -> vector<256x128xf32>
    %49 = arith.addf %42, %48 : vector<256x128xf32>
    %c0_56 = arith.constant 0 : index
    %c0_57 = arith.constant 0 : index
    %c2_58 = arith.constant 2 : index
    %c1_59 = arith.constant 1 : index
    %c0_60 = arith.constant 0 : index
    %50 = vector.load %arg2[%c0_56, %c0_57, %c2_58, %c1_59, %c0_60] : memref<1x1x18x18x4xf32, #tpu.memory_space<vmem>>, vector<1x1x16x16x4xf32>
    %51 = vector.shape_cast %50 : vector<1x1x16x16x4xf32> to vector<16x16x4xf32>
    %52 = vector.shape_cast %51 : vector<16x16x4xf32> to vector<256x4xf32>
    %c7 = arith.constant 7 : index
    %c0_61 = arith.constant 0 : index
    %c0_62 = arith.constant 0 : index
    %53 = vector.load %arg3[%c7, %c0_61, %c0_62] : memref<9x4x128xf32, #tpu.memory_space<vmem>>, vector<1x4x128xf32>
    %54 = vector.shape_cast %53 : vector<1x4x128xf32> to vector<4x128xf32>
    %cst_63 = arith.constant dense<0.000000e+00> : vector<256x128xf32>
    %55 = tpu.matmul %52, %54, %cst_63 {dimension_numbers = #tpu.dot_dimension_numbers<[1], [0], [0], [1], [0, 0, 1, 1], [], []>} : vector<256x4xf32>, vector<4x128xf32>, vector<256x128xf32> -> vector<256x128xf32>
    %56 = arith.addf %49, %55 : vector<256x128xf32>
    %c0_64 = arith.constant 0 : index
    %c0_65 = arith.constant 0 : index
    %c2_66 = arith.constant 2 : index
    %c2_67 = arith.constant 2 : index
    %c0_68 = arith.constant 0 : index
    %57 = vector.load %arg2[%c0_64, %c0_65, %c2_66, %c2_67, %c0_68] : memref<1x1x18x18x4xf32, #tpu.memory_space<vmem>>, vector<1x1x16x16x4xf32>
    %58 = vector.shape_cast %57 : vector<1x1x16x16x4xf32> to vector<16x16x4xf32>
    %59 = vector.shape_cast %58 : vector<16x16x4xf32> to vector<256x4xf32>
    %c8 = arith.constant 8 : index
    %c0_69 = arith.constant 0 : index
    %c0_70 = arith.constant 0 : index
    %60 = vector.load %arg3[%c8, %c0_69, %c0_70] : memref<9x4x128xf32, #tpu.memory_space<vmem>>, vector<1x4x128xf32>
    %61 = vector.shape_cast %60 : vector<1x4x128xf32> to vector<4x128xf32>
    %cst_71 = arith.constant dense<0.000000e+00> : vector<256x128xf32>
    %62 = tpu.matmul %59, %61, %cst_71 {dimension_numbers = #tpu.dot_dimension_numbers<[1], [0], [0], [1], [0, 0, 1, 1], [], []>} : vector<256x4xf32>, vector<4x128xf32>, vector<256x128xf32> -> vector<256x128xf32>
    %63 = arith.addf %56, %62 : vector<256x128xf32>
    %c0_72 = arith.constant 0 : index
    %c0_73 = arith.constant 0 : index
    %64 = vector.load %arg4[%c0_72, %c0_73] : memref<1x128xf32, #tpu.memory_space<vmem>>, vector<1x128xf32>
    %65 = vector.broadcast %64 : vector<1x128xf32> to vector<256x128xf32>
    %66 = arith.addf %63, %65 : vector<256x128xf32>
    %cst_74 = arith.constant 0.000000e+00 : f32
    %67 = vector.broadcast %cst_74 : f32 to vector<256x128xf32>
    %68 = arith.maximumf %66, %67 : vector<256x128xf32>
    %69 = vector.shape_cast %68 : vector<256x128xf32> to vector<16x16x128xf32>
    %c0_75 = arith.constant 0 : index
    %c0_76 = arith.constant 0 : index
    %c0_77 = arith.constant 0 : index
    %c0_78 = arith.constant 0 : index
    %70 = vector.load %arg5[%c0_75, %c0_76, %c0_77, %c0_78] : memref<1x16x16x128xf32, #tpu.memory_space<vmem>>, vector<1x16x16x128xf32>
    %71 = vector.shape_cast %70 : vector<1x16x16x128xf32> to vector<16x16x128xf32>
    %72 = vector.shape_cast %69 : vector<16x16x128xf32> to vector<1x16x16x128xf32>
    tpu.vector_store %arg5[%c0_75, %c0_76, %c0_77, %c0_78], %72 {strides = array<i32>} : memref<1x16x16x128xf32, #tpu.memory_space<vmem>>, vector<1x16x16x128xf32>,
    return
  }
  func.func @transform_0(%arg0: i32, %arg1: i32) -> (i32, i32, i32, i32, i32) {
    %c0_i32 = arith.constant 0 : i32
    %c0_i32_0 = arith.constant 0 : i32
    %c0_i32_1 = arith.constant 0 : i32
    %c0_i32_2 = arith.constant 0 : i32
    return %arg0, %arg1, %c0_i32, %c0_i32_0, %c0_i32_1 : i32, i32, i32, i32, i32
  }
  func.func @transform_1(%arg0: i32, %arg1: i32) -> (i32, i32, i32) {
    %c0_i32 = arith.constant 0 : i32
    %c0_i32_0 = arith.constant 0 : i32
    %c0_i32_1 = arith.constant 0 : i32
    %c0_i32_2 = arith.constant 0 : i32
    return %c0_i32, %c0_i32_0, %c0_i32_1 : i32, i32, i32
  }
  func.func @transform_2(%arg0: i32, %arg1: i32) -> (i32, i32) {
    %c0_i32 = arith.constant 0 : i32
    %c0_i32_0 = arith.constant 0 : i32
    %c0_i32_1 = arith.constant 0 : i32
    return %c0_i32, %c0_i32_0 : i32, i32
  }
  func.func @transform_3(%arg0: i32, %arg1: i32) -> (i32, i32, i32, i32) {
    %c0_i32 = arith.constant 0 : i32
    %c0_i32_0 = arith.constant 0 : i32
    %c0_i32_1 = arith.constant 0 : i32
    return %arg0, %arg1, %c0_i32, %c0_i32_0 : i32, i32, i32, i32
  }
}

</mosaic_0001>

<bundles_post_ra>
// kernel: tpu_custom_call.1
= control target key start
LH: loop header
LB: loop body
LE: loop exit
PB: predicated region body
PF: predicated region fallthrough
CT: control target
= control target key end

     0   :  { %8 = vsyncpa [#allocation3], 0  ;;  %s6869_s0 = inlined_call_operand.vmem [shape: f32[2,1,18,18,4], index: 0, kind: input, shape index: {}]   ;;  %s6870_s1 = inlined_call_operand.vmem [shape: f32[9,4,128], index: 1, kind: input, shape index: {}]   ;;  %s6871_s2 = inlined_call_operand.vmem [shape: f32[1,128], index: 2, kind: input, shape index: {}]   ;;  %s6872_s3 = inlined_call_operand.hbm [shape: f32[2,16,16,128], index: 3, kind: output, shape index: {}]  }
   0x1   :  { %10 = vsyncpa [#allocation3 + $0x1], 0  ;;  %s5268_s12 = smov 0   ;;  %s5270_s13 = smov 0  }
   0x2   :  { %s5272_s14 = smov 0   ;;  %s5274_s15 = smov 0  }
   0x3   :  { %s5276_s16 = smov 0   ;;  %s5278_s17 = smov 0  }
   0x4 LB: > { %s3849_s18 = sadd.s32 4294967295, %s5243_s17   ;;  %s3850_s19 = sadd.s32 4294967294, %s5243_s17   ;;  %s5243_s17 = sphi %s5278_s17, %s16_s17   ;;  %s5239_s16 = sphi %s5276_s16, %s7107_s16   ;;  %s5235_s15 = sphi %s5274_s15, %s7106_s15   ;;  %s5231_s14 = sphi %s5272_s14, %s7105_s14   ;;  %s5227_s13 = sphi %s5270_s13, %s7104_s13   ;;  %s5223_s12 = sphi %s5268_s12, %s7103_s12  }
   0x5   : > { %s28_s20 = sadd.s32 1, %s5239_s16  ;;  %s107_s21 = sadd.s32 1, %s5231_s14 }
   0x6   : > { %p30_p0 = scmp.ge.s32.totalorder %s28_s20, 2  ;;  %p117_p1 = scmp.ne.s32.totalorder %s5231_s14, %s5227_s13 }
   0x7   : > { %p118_p2 = scmp.eq.s32.totalorder %s3849_s18, 1  ;;  %p123_p3 = scmp.ne.s32.totalorder %s5227_s13, %s5223_s12 }
   0x8   : > { %s7109_s20 = smov (%p30_p0, %s28_s20), 0  ;;  %p124_p5 = scmp.eq.s32.totalorder %s3850_s19, 1 }
   0x9   : > { %p5308_p4 = por %p118_p2, %p117_p1  ;;  %s102_s23 = ssub.s32 %s5239_s16, %s7109_s20 }
   0xa   : > { %p3853_p6 = scmp.ge.s32.totalorder %s5243_s17, 1  ;;  %p105_p7 = scmp.eq.s32.totalorder %s102_s23, 0 }
   0xb   : > { %p5315_p8 = por %p124_p5, %p123_p3  ;;  %p160_p9 = scmp.lt.s32.totalorder %s5243_s17, 3 }
   0xc   : > { %s5321_s25 = scalar_select %p105_p7, %s5231_s14, %s107_s21  }
   0xd   : > { %p161_p10 = pnand %p3853_p6, %p160_p9 }
   0xf   : > { %164 = sbr.rel (%p161_p10) target bundleno = 531 (0x213), region = 32 }
  0x14   : > { %v3856_v0 = vld [vmem:[%s6870_s1 + $0x4] sm:$0xf]  ;;  %vm362_vm0 = vcmask 1043456   ;;  %p188_p11 = scmp.lt.s32.totalorder %s5235_s15, 1  ;;  %v230_v1 = vld [vmem:[%s6870_s1] sm:$0xf] }
  0x15   : > { %5107 = vmatprep.subr.msk.mxu1 %vm362_vm0, %v3856_v0  ;;  %4657 = vmatprep.subr.msk.mxu0 %vm362_vm0, %v3856_v0  ;;  %v3923_v2 = vld [vmem:[%s6870_s1 + $0x8] sm:$0xf]  ;;  %vm265_vm1 = vcmask 31744   ;;  %v5368_v9 = vld [vmem:[%s6870_s1 + $0xc] sm:$0xf]  ;;  %s4359_s10 = sshll.u32 %s5235_s15, 12 }
  0x16   : > { %5108 = vmatpush3.msk.msra.mxu1 %vm362_vm0, %v3856_v0  ;;  %4658 = vmatpush3.msk.msra.mxu0 %vm362_vm0, %v3856_v0  ;;  %s189_s5 = scalar_select %p188_p11, %s5235_s15, 1  ;;  %v5373_v10 = vld [vmem:[%s6870_s1 + $0x10] sm:$0xf]  ;;  %v5532_v43 = vld [vmem:[%s6870_s1 + $0x14] sm:$0xf] }
  0x17   : > { %4707 = vmatprep.subr.msk.mxu1 %vm362_vm0, %v230_v1  ;;  %4757 = vmatprep.subr.msk.mxu0 %vm362_vm0, %v3923_v2  ;;  %v5537_v44 = vld [vmem:[%s6870_s1 + $0x18] sm:$0xf]  ;;  %s6816_s21 = scalar_lea.hbm %s6872_s3, %s4359_s10  ;;  %s5245_s26 = smov [#allocation2]  }
  0x18   : > { %s5109_s6 = smul.u32 432, %s189_s5  ;;  %s185_s5 = sand.u32 1, %s5227_s13  }
  0x19   : > { %s3854_s8 = sshll.u32 %s185_s5, 8  ;;  %s6824_s15 = scalar_lea.sflag [#allocation3], %s185_s5 }
  0x1a   : > { %s5343_s9 = scalar_lea.vmem %s6869_s0, %s5109_s6  ;;  %s5171_s27 = sshll.u32 %s5245_s26, 4  ;;  %s5172_s27 = int_to_ptr.vmem [resolvable:$false] %s5171_s27 }
  0x1b   : > { %v231_v3 = vld [vmem:[%s5343_s9 + $0x1] sm:$0xff]  ;;  %v232_v5 = vld [vmem:[%s5343_s9 + $0x9] sm:$0xff]  ;;  %v5357_v7 = vld [vmem:[%s5343_s9 + $0x19] sm:$0xff]  ;;  %s5173_s28 = scalar_lea.vmem %s5172_s27, 8192 }
  0x1c   : > { %v5347_v4 = vld [vmem:[%s5343_s9 + $0xc1] sm:$0xff]  ;;  %4659 = vmatprep.mubr.msk.f32.mxu0 %vm265_vm1, %v231_v3  ;;  %v5354_v6 = vld [vmem:[%s5343_s9 + $0xc9] sm:$0xff]  ;;  %v5360_v8 = vld [vmem:[%s5343_s9 + $0xd9] sm:$0xff] }
  0x1d   : > { %4683 = vmatprep.mubr.msk.f32.mxu1 %vm265_vm1, %v5347_v4  ;;  %4660 = vmatmul.mubr.msk.f32.vlgmr.msra.gmra.mxu0 %vm265_vm1, %v232_v5  ;;  %v5378_v11 = vld [vmem:[%s5343_s9 + $0x21] sm:$0xff]  ;;  %v5388_v13 = vld [vmem:[%s5343_s9 + $0x31] sm:$0xff]  ;;  %v5406_v15 = vld [vmem:[%s5343_s9 + $0x39] sm:$0xff] }
  0x1e   : > { %4684 = vmatmul.mubr.msk.f32.vlgmr.msra.gmra.mxu1 %vm265_vm1, %v5354_v6  ;;  %4758 = vmatpush3.msk.msra.mxu0 %vm362_vm0, %v3923_v2  ;;  %v5381_v12 = vld [vmem:[%s5343_s9 + $0xe1] sm:$0xff]  ;;  %v5391_v14 = vld [vmem:[%s5343_s9 + $0xf1] sm:$0xff]  ;;  %v5409_v16 = vld [vmem:[%s5343_s9 + $0xf9] sm:$0xff] }
  0x1f   : > { %4708 = vmatpush3.msk.msra.mxu1 %vm362_vm0, %v230_v1  ;;  %4662 = vmatprep.mubr.msk.f32.mxu0 %vm265_vm1, %v5357_v7  ;;  %v5412_v17 = vld [vmem:[%s5343_s9 + $0x49] sm:$0xff]  ;;  %v5426_v19 = vld [vmem:[%s5343_s9 + $0x51] sm:$0xff]  ;;  %v5432_v21 = vld [vmem:[%s5343_s9 + $0x61] sm:$0xff] }
  0x20   : > { %4686 = vmatprep.mubr.msk.f32.mxu1 %vm265_vm1, %v5360_v8  ;;  %4807 = vmatprep.subr.msk.mxu1 %vm362_vm0, %v5368_v9  ;;  %v5415_v18 = vld [vmem:[%s5343_s9 + $0x109] sm:$0xff]  ;;  %v5429_v20 = vld [vmem:[%s5343_s9 + $0x111] sm:$0xff]  ;;  %v5435_v22 = vld [vmem:[%s5343_s9 + $0x121] sm:$0xff] }
  0x21   : > { %4857 = vmatprep.subr.msk.mxu0 %vm362_vm0, %v5373_v10  ;;  %4663 = vmatmul.mubr.msk.f32.gmra.mxu0 %vm265_vm1, %v5378_v11  ;;  %v5446_v23 = vld [vmem:[%s5343_s9 + $0x69] sm:$0xff]  ;;  %v5452_v25 = vld [vmem:[%s5343_s9 + $0x79] sm:$0xff]  ;;  %v5466_v27 = vld [vmem:[%s5343_s9 + $0x81] sm:$0xff] }
  0x22   : > { %4687 = vmatmul.mubr.msk.f32.gmra.mxu1 %vm265_vm1, %v5381_v12  ;;  %4665 = vmatprep.mubr.msk.f32.mxu0 %vm265_vm1, %v5388_v13  ;;  %v5449_v24 = vld [vmem:[%s5343_s9 + $0x129] sm:$0xff]  ;;  %v5455_v26 = vld [vmem:[%s5343_s9 + $0x139] sm:$0xff]  ;;  %v5469_v28 = vld [vmem:[%s5343_s9 + $0x141] sm:$0xff] }
  0x23   : > { %4689 = vmatprep.mubr.msk.f32.mxu1 %vm265_vm1, %v5391_v14  ;;  %v5472_v29 = vld [vmem:[%s5343_s9 + $0x91] sm:$0xff]  ;;  %v5486_v31 = vld [vmem:[%s5343_s9 + $0x99] sm:$0xff]  ;;  %v5492_v33 = vld [vmem:[%s5343_s9 + $0xa9] sm:$0xff] }
  0x24   : > { %v5475_v30 = vld [vmem:[%s5343_s9 + $0x151] sm:$0xff]  ;;  %v5489_v32 = vld [vmem:[%s5343_s9 + $0x159] sm:$0xff]  ;;  %v5495_v34 = vld [vmem:[%s5343_s9 + $0x169] sm:$0xff] }
  0x25   : > { %4666 = vmatmul.mubr.msk.f32.gmra.mxu0 %vm265_vm1, %v5406_v15  ;;  %v5506_v35 = vld [vmem:[%s5343_s9 + $0xb1] sm:$0xff]  ;;  %v198_v37 = vld [vmem:[%s5343_s9] sm:$0xff]  ;;  %v199_v39 = vld [vmem:[%s5343_s9 + $0x8] sm:$0xff] }
  0x26   : > { %4690 = vmatmul.mubr.msk.f32.gmra.mxu1 %vm265_vm1, %v5409_v16  ;;  %4668 = vmatprep.mubr.msk.f32.mxu0 %vm265_vm1, %v5412_v17  ;;  %v5509_v36 = vld [vmem:[%s5343_s9 + $0x171] sm:$0xff]  ;;  %v915_v38 = vld [vmem:[%s5343_s9 + $0x2] sm:$0xff]  ;;  %v5525_v42 = vld [vmem:[%s5343_s9 + $0x1a] sm:$0xff] }
  0x27   : > { %4692 = vmatprep.mubr.msk.f32.mxu1 %vm265_vm1, %v5415_v18  ;;  %6935 = vst [vmem:[#allocation5_spill] sm:$0xff] %v5509_v36  ;;  %v916_v40 = vld [vmem:[%s5343_s9 + $0xa] sm:$0xff]  ;;  %v5522_v41 = vld [vmem:[%s5343_s9 + $0x18] sm:$0xff]  ;;  %6936 = vst [vmem:[#allocation6_spill] sm:$0xff] %v5525_v42 }
  0x28   : > { %v5544_v45 = vld [vmem:[%s5343_s9 + $0x20] sm:$0xff]  ;;  %v5554_v47 = vld [vmem:[%s5343_s9 + $0x30] sm:$0xff]  ;;  %v5572_v49 = vld [vmem:[%s5343_s9 + $0x38] sm:$0xff] }
  0x29   : > { %4669 = vmatmul.mubr.msk.f32.gmra.mxu0 %vm265_vm1, %v5426_v19  ;;  %v5547_v46 = vld [vmem:[%s5343_s9 + $0x22] sm:$0xff]  ;;  %v5557_v48 = vld [vmem:[%s5343_s9 + $0x32] sm:$0xff]  ;;  %v5575_v50 = vld [vmem:[%s5343_s9 + $0x3a] sm:$0xff] }
  0x2a   : > { %4693 = vmatmul.mubr.msk.f32.gmra.mxu1 %vm265_vm1, %v5429_v20  ;;  %4671 = vmatprep.mubr.msk.f32.mxu0 %vm265_vm1, %v5432_v21  ;;  %6937 = vst [vmem:[#allocation7_spill] sm:$0xff] %v5547_v46  ;;  %6938 = vst [vmem:[#allocation8_spill] sm:$0xff] %v5557_v48  ;;  %v5578_v51 = vld [vmem:[%s5343_s9 + $0x48] sm:$0xff]  ;;  %v5592_v53 = vld [vmem:[%s5343_s9 + $0x50] sm:$0xff] }
  0x2b   : > { %4695 = vmatprep.mubr.msk.f32.mxu1 %vm265_vm1, %v5435_v22  ;;  %6939 = vst [vmem:[#allocation9_spill] sm:$0xff] %v5575_v50  ;;  %v5581_v52 = vld [vmem:[%s5343_s9 + $0x4a] sm:$0xff]  ;;  %v5595_v54 = vld [vmem:[%s5343_s9 + $0x52] sm:$0xff]  ;;  %v5598_v55 = vld [vmem:[%s5343_s9 + $0x60] sm:$0xff] }
  0x2c   : > { %6940 = vst [vmem:[#allocation10_spill] sm:$0xff] %v5581_v52  ;;  %6941 = vst [vmem:[#allocation11_spill] sm:$0xff] %v5595_v54  ;;  %v5601_v56 = vld [vmem:[%s5343_s9 + $0x62] sm:$0xff]  ;;  %v5615_v58 = vld [vmem:[%s5343_s9 + $0x6a] sm:$0xff] }
  0x2d   : > { %4672 = vmatmul.mubr.msk.f32.gmra.mxu0 %vm265_vm1, %v5446_v23  ;;  %6942 = vst [vmem:[#allocation12_spill] sm:$0xff] %v5601_v56  ;;  %v5612_v57 = vld [vmem:[%s5343_s9 + $0x68] sm:$0xff]  ;;  %6943 = vst [vmem:[#allocation13_spill] sm:$0xff] %v5615_v58  ;;  %v5618_v59 = vld [vmem:[%s5343_s9 + $0x78] sm:$0xff] }
  0x2e   : > { %4696 = vmatmul.mubr.msk.f32.gmra.mxu1 %vm265_vm1, %v5449_v24  ;;  %4674 = vmatprep.mubr.msk.f32.mxu0 %vm265_vm1, %v5452_v25  ;;  %v5621_v60 = vld [vmem:[%s5343_s9 + $0x7a] sm:$0xff]  ;;  %v5635_v62 = vld [vmem:[%s5343_s9 + $0x82] sm:$0xff]  ;;  %v5638_v63 = vld [vmem:[%s5343_s9 + $0x90] sm:$0xff] }
  0x2f   : > { %4698 = vmatprep.mubr.msk.f32.mxu1 %vm265_vm1, %v5455_v26  ;;  %6944 = vst [vmem:[#allocation14_spill] sm:$0xff] %v5621_v60  ;;  %v5632_v61 = vld [vmem:[%s5343_s9 + $0x80] sm:$0xff]  ;;  %6945 = vst [vmem:[#allocation15_spill] sm:$0xff] %v5635_v62  ;;  %v5641_v0 = vld [vmem:[%s5343_s9 + $0x92] sm:$0xff] }
  0x30   : > { %6946 = vst [vmem:[#allocation16_spill] sm:$0xff] %v5641_v0  ;;  %v5652_v1 = vld [vmem:[%s5343_s9 + $0x98] sm:$0xff]  ;;  %v5658_v3 = vld [vmem:[%s5343_s9 + $0xa8] sm:$0xff] }
  0x31   : > { %4675 = vmatmul.mubr.msk.f32.gmra.mxu0 %vm265_vm1, %v5466_v27  ;;  %v5655_v2 = vld [vmem:[%s5343_s9 + $0x9a] sm:$0xff]  ;;  %v5661_v5 = vld [vmem:[%s5343_s9 + $0xaa] sm:$0xff] }
  0x32   : > { %4699 = vmatmul.mubr.msk.f32.gmra.mxu1 %vm265_vm1, %v5469_v28  ;;  %4677 = vmatprep.mubr.msk.f32.mxu0 %vm265_vm1, %v5472_v29  ;;  %6947 = vst [vmem:[#allocation17_spill] sm:$0xff] %v5655_v2  ;;  %6948 = vst [vmem:[#allocation18_spill] sm:$0xff] %v5661_v5 }
  0x33   : > { %4701 = vmatprep.mubr.msk.f32.mxu1 %vm265_vm1, %v5475_v30 }
  0x35   : > { %4678 = vmatmul.mubr.msk.f32.gmra.mxu0 %vm265_vm1, %v5486_v31 }
  0x36   : > { %4702 = vmatmul.mubr.msk.f32.gmra.mxu1 %vm265_vm1, %v5489_v32  ;;  %4680 = vmatprep.mubr.msk.f32.mxu0 %vm265_vm1, %v5492_v33 }
  0x37   : > { %4704 = vmatprep.mubr.msk.f32.mxu1 %vm265_vm1, %v5495_v34 }
  0x39   : > { %4681 = vmatmul.mubr.msk.f32.gmra.mxu0 %vm265_vm1, %v5506_v35 }
  0x3a   : > { %4705 = vmatmul.mubr.msk.f32.gmra.mxu1 %vm265_vm1, %v5509_v36  ;;  %4759 = vmatprep.mubr.msk.f32.mxu0 %vm265_vm1, %v915_v38  ;;  %v5681_v38 = vld [vmem:[%s5343_s9 + $0xc2] sm:$0xff]  ;;  %v5821_v36 = vld [vmem:[%s5343_s9 + $0x16a] sm:$0xff] }
  0x3b   : > { %4709 = vmatprep.mubr.msk.f32.mxu1 %vm265_vm1, %v198_v37  ;;  %v5678_v37 = vld [vmem:[%s5343_s9 + $0xc0] sm:$0xff]  ;;  %6950 = vst [vmem:[#allocation20_spill] sm:$0xff] %v5681_v38  ;;  %6964 = vst [vmem:[#allocation34_spill] sm:$0xff] %v5821_v36 }
  0x3d   : > { %4760 = vmatmul.mubr.msk.f32.vlgmr.msra.gmra.mxu0 %vm265_vm1, %v916_v40  ;;  %v5695_v40 = vld [vmem:[%s5343_s9 + $0xca] sm:$0xff] }
  0x3e   : > { %4710 = vmatmul.mubr.msk.f32.vlgmr.msra.gmra.mxu1 %vm265_vm1, %v199_v39  ;;  %4858 = vmatpush3.msk.msra.mxu0 %vm362_vm0, %v5373_v10  ;;  %v5675_v10 = vld [vmem:[%s5343_s9 + $0xb2] sm:$0xff]  ;;  %v5692_v39 = vld [vmem:[%s5343_s9 + $0xc8] sm:$0xff]  ;;  %6951 = vst [vmem:[#allocation21_spill] sm:$0xff] %v5695_v40 }
  0x3f   : > { %4808 = vmatpush3.msk.msra.mxu1 %vm362_vm0, %v5368_v9  ;;  %4712 = vmatprep.mubr.msk.f32.mxu1 %vm265_vm1, %v5522_v41  ;;  %v5672_v9 = vld [vmem:[%s5343_s9 + $0xb0] sm:$0xff]  ;;  %6949 = vst [vmem:[#allocation19_spill] sm:$0xff] %v5675_v10 }
  0x40   : > { %4762 = vmatprep.mubr.msk.f32.mxu0 %vm265_vm1, %v5525_v42  ;;  %4907 = vmatprep.subr.msk.mxu1 %vm362_vm0, %v5532_v43  ;;  %v5818_v42 = vld [vmem:[%s5343_s9 + $0x168] sm:$0xff] }
  0x41   : > { %4957 = vmatprep.subr.msk.mxu0 %vm362_vm0, %v5537_v44  ;;  %4763 = vmatmul.mubr.msk.f32.gmra.mxu0 %vm265_vm1, %v5547_v46  ;;  %v5801_v46 = vld [vmem:[%s5343_s9 + $0x152] sm:$0xff] }
  0x42   : > { %4713 = vmatmul.mubr.msk.f32.gmra.mxu1 %vm265_vm1, %v5544_v45  ;;  %4765 = vmatprep.mubr.msk.f32.mxu0 %vm265_vm1, %v5557_v48  ;;  %v5798_v48 = vld [vmem:[%s5343_s9 + $0x150] sm:$0xff]  ;;  %6962 = vst [vmem:[#allocation32_spill] sm:$0xff] %v5801_v46 }
  0x43   : > { %4715 = vmatprep.mubr.msk.f32.mxu1 %vm265_vm1, %v5554_v47 }
  0x45   : > { %4766 = vmatmul.mubr.msk.f32.gmra.mxu0 %vm265_vm1, %v5575_v50  ;;  %v5781_v50 = vld [vmem:[%s5343_s9 + $0x13a] sm:$0xff] }
  0x46   : > { %4716 = vmatmul.mubr.msk.f32.gmra.mxu1 %vm265_vm1, %v5572_v49  ;;  %4768 = vmatprep.mubr.msk.f32.mxu0 %vm265_vm1, %v5581_v52  ;;  %v5778_v52 = vld [vmem:[%s5343_s9 + $0x138] sm:$0xff]  ;;  %6960 = vst [vmem:[#allocation30_spill] sm:$0xff] %v5781_v50 }
  0x47   : > { %4718 = vmatprep.mubr.msk.f32.mxu1 %vm265_vm1, %v5578_v51 }
  0x49   : > { %4769 = vmatmul.mubr.msk.f32.gmra.mxu0 %vm265_vm1, %v5595_v54  ;;  %v5761_v54 = vld [vmem:[%s5343_s9 + $0x122] sm:$0xff] }
  0x4a   : > { %4719 = vmatmul.mubr.msk.f32.gmra.mxu1 %vm265_vm1, %v5592_v53  ;;  %4771 = vmatprep.mubr.msk.f32.mxu0 %vm265_vm1, %v5601_v56  ;;  %v5758_v56 = vld [vmem:[%s5343_s9 + $0x120] sm:$0xff]  ;;  %6958 = vst [vmem:[#allocation28_spill] sm:$0xff] %v5761_v54 }
  0x4b   : > { %4721 = vmatprep.mubr.msk.f32.mxu1 %vm265_vm1, %v5598_v55 }
  0x4d   : > { %4772 = vmatmul.mubr.msk.f32.gmra.mxu0 %vm265_vm1, %v5615_v58  ;;  %v5741_v58 = vld [vmem:[%s5343_s9 + $0x10a] sm:$0xff] }
  0x4e   : > { %4722 = vmatmul.mubr.msk.f32.gmra.mxu1 %vm265_vm1, %v5612_v57  ;;  %4774 = vmatprep.mubr.msk.f32.mxu0 %vm265_vm1, %v5621_v60  ;;  %v5738_v60 = vld [vmem:[%s5343_s9 + $0x108] sm:$0xff]  ;;  %6956 = vst [vmem:[#allocation26_spill] sm:$0xff] %v5741_v58 }
  0x4f   : > { %4724 = vmatprep.mubr.msk.f32.mxu1 %vm265_vm1, %v5618_v59 }
  0x51   : > { %4775 = vmatmul.mubr.msk.f32.gmra.mxu0 %vm265_vm1, %v5635_v62  ;;  %v5721_v62 = vld [vmem:[%s5343_s9 + $0xf2] sm:$0xff] }
  0x52   : > { %4725 = vmatmul.mubr.msk.f32.gmra.mxu1 %vm265_vm1, %v5632_v61  ;;  %4777 = vmatprep.mubr.msk.f32.mxu0 %vm265_vm1, %v5641_v0  ;;  %v5718_v0 = vld [vmem:[%s5343_s9 + $0xf0] sm:$0xff]  ;;  %6954 = vst [vmem:[#allocation24_spill] sm:$0xff] %v5721_v62 }
  0x53   : > { %4727 = vmatprep.mubr.msk.f32.mxu1 %vm265_vm1, %v5638_v63 }
  0x55   : > { %4778 = vmatmul.mubr.msk.f32.gmra.mxu0 %vm265_vm1, %v5655_v2  ;;  %v5701_v2 = vld [vmem:[%s5343_s9 + $0xda] sm:$0xff] }
  0x56   : > { %4728 = vmatmul.mubr.msk.f32.gmra.mxu1 %vm265_vm1, %v5652_v1  ;;  %4780 = vmatprep.mubr.msk.f32.mxu0 %vm265_vm1, %v5661_v5  ;;  %v5698_v5 = vld [vmem:[%s5343_s9 + $0xd8] sm:$0xff]  ;;  %6952 = vst [vmem:[#allocation22_spill] sm:$0xff] %v5701_v2 }
  0x57   : > { %4730 = vmatprep.mubr.msk.f32.mxu1 %vm265_vm1, %v5658_v3 }
  0x59   : > { %4781 = vmatmul.mubr.msk.f32.gmra.mxu0 %vm265_vm1, %v5675_v10  ;;  %v5715_v10 = vld [vmem:[%s5343_s9 + $0xe2] sm:$0xff] }
  0x5a   : > { %4731 = vmatmul.mubr.msk.f32.gmra.mxu1 %vm265_vm1, %v5672_v9  ;;  %4783 = vmatprep.mubr.msk.f32.mxu0 %vm265_vm1, %v5681_v38  ;;  %v5712_v38 = vld [vmem:[%s5343_s9 + $0xe0] sm:$0xff]  ;;  %6953 = vst [vmem:[#allocation23_spill] sm:$0xff] %v5715_v10 }
  0x5b   : > { %4733 = vmatprep.mubr.msk.f32.mxu1 %vm265_vm1, %v5678_v37 }
  0x5d   : > { %4784 = vmatmul.mubr.msk.f32.gmra.mxu0 %vm265_vm1, %v5695_v40  ;;  %v5735_v40 = vld [vmem:[%s5343_s9 + $0xfa] sm:$0xff] }
  0x5e   : > { %4734 = vmatmul.mubr.msk.f32.gmra.mxu1 %vm265_vm1, %v5692_v39  ;;  %4786 = vmatprep.mubr.msk.f32.mxu0 %vm265_vm1, %v5701_v2  ;;  %v5732_v2 = vld [vmem:[%s5343_s9 + $0xf8] sm:$0xff]  ;;  %6955 = vst [vmem:[#allocation25_spill] sm:$0xff] %v5735_v40 }
  0x5f   : > { %4736 = vmatprep.mubr.msk.f32.mxu1 %vm265_vm1, %v5698_v5 }
  0x61   : > { %4787 = vmatmul.mubr.msk.f32.gmra.mxu0 %vm265_vm1, %v5715_v10  ;;  %v5755_v10 = vld [vmem:[%s5343_s9 + $0x112] sm:$0xff] }
  0x62   : > { %4737 = vmatmul.mubr.msk.f32.gmra.mxu1 %vm265_vm1, %v5712_v38  ;;  %4789 = vmatprep.mubr.msk.f32.mxu0 %vm265_vm1, %v5721_v62  ;;  %v5752_v62 = vld [vmem:[%s5343_s9 + $0x110] sm:$0xff]  ;;  %6957 = vst [vmem:[#allocation27_spill] sm:$0xff] %v5755_v10 }
  0x63   : > { %4739 = vmatprep.mubr.msk.f32.mxu1 %vm265_vm1, %v5718_v0 }
  0x65   : > { %4790 = vmatmul.mubr.msk.f32.gmra.mxu0 %vm265_vm1, %v5735_v40  ;;  %v5775_v40 = vld [vmem:[%s5343_s9 + $0x12a] sm:$0xff] }
  0x66   : > { %4740 = vmatmul.mubr.msk.f32.gmra.mxu1 %vm265_vm1, %v5732_v2  ;;  %4792 = vmatprep.mubr.msk.f32.mxu0 %vm265_vm1, %v5741_v58  ;;  %v5772_v58 = vld [vmem:[%s5343_s9 + $0x128] sm:$0xff]  ;;  %6959 = vst [vmem:[#allocation29_spill] sm:$0xff] %v5775_v40 }
  0x67   : > { %4742 = vmatprep.mubr.msk.f32.mxu1 %vm265_vm1, %v5738_v60 }
  0x69   : > { %4793 = vmatmul.mubr.msk.f32.gmra.mxu0 %vm265_vm1, %v5755_v10  ;;  %v5795_v10 = vld [vmem:[%s5343_s9 + $0x142] sm:$0xff] }
  0x6a   : > { %4743 = vmatmul.mubr.msk.f32.gmra.mxu1 %vm265_vm1, %v5752_v62  ;;  %4795 = vmatprep.mubr.msk.f32.mxu0 %vm265_vm1, %v5761_v54  ;;  %v5792_v54 = vld [vmem:[%s5343_s9 + $0x140] sm:$0xff]  ;;  %6961 = vst [vmem:[#allocation31_spill] sm:$0xff] %v5795_v10 }
  0x6b   : > { %4745 = vmatprep.mubr.msk.f32.mxu1 %vm265_vm1, %v5758_v56 }
  0x6d   : > { %4796 = vmatmul.mubr.msk.f32.gmra.mxu0 %vm265_vm1, %v5775_v40  ;;  %v5815_v40 = vld [vmem:[%s5343_s9 + $0x15a] sm:$0xff] }
  0x6e   : > { %4746 = vmatmul.mubr.msk.f32.gmra.mxu1 %vm265_vm1, %v5772_v58  ;;  %4798 = vmatprep.mubr.msk.f32.mxu0 %vm265_vm1, %v5781_v50  ;;  %v5812_v50 = vld [vmem:[%s5343_s9 + $0x158] sm:$0xff]  ;;  %6963 = vst [vmem:[#allocation33_spill] sm:$0xff] %v5815_v40 }
  0x6f   : > { %4748 = vmatprep.mubr.msk.f32.mxu1 %vm265_vm1, %v5778_v52 }
  0x71   : > { %4799 = vmatmul.mubr.msk.f32.gmra.mxu0 %vm265_vm1, %v5795_v10  ;;  %v5835_v10 = vld [vmem:[%s5343_s9 + $0x172] sm:$0xff] }
  0x72   : > { %4749 = vmatmul.mubr.msk.f32.gmra.mxu1 %vm265_vm1, %v5792_v54  ;;  %4801 = vmatprep.mubr.msk.f32.mxu0 %vm265_vm1, %v5801_v46  ;;  %v5832_v46 = vld [vmem:[%s5343_s9 + $0x170] sm:$0xff]  ;;  %6965 = vst [vmem:[#allocation35_spill] sm:$0xff] %v5835_v10 }
  0x73   : > { %4751 = vmatprep.mubr.msk.f32.mxu1 %vm265_vm1, %v5798_v48 }
  0x75   : > { %4802 = vmatmul.mubr.msk.f32.gmra.mxu0 %vm265_vm1, %v5815_v40 }
  0x76   : > { %4752 = vmatmul.mubr.msk.f32.gmra.mxu1 %vm265_vm1, %v5812_v50  ;;  %4804 = vmatprep.mubr.msk.f32.mxu0 %vm265_vm1, %v5821_v36  ;;  %v5852_v36 = vld [vmem:[%s6870_s1 + $0x1c] sm:$0xf] }
  0x77   : > { %4754 = vmatprep.mubr.msk.f32.mxu1 %vm265_vm1, %v5818_v42 }
  0x79   : > { %4805 = vmatmul.mubr.msk.f32.gmra.mxu0 %vm265_vm1, %v5835_v10  ;;  %v5857_v10 = vld [vmem:[%s6870_s1 + $0x20] sm:$0xf] }
  0x7a   : > { %4755 = vmatmul.mubr.msk.f32.gmra.mxu1 %vm265_vm1, %v5832_v46  ;;  %4859 = vmatprep.mubr.msk.f32.mxu0 %vm265_vm1, %v5357_v7  ;;  %v6967_v7 = vld [vmem:[#allocation5_spill] sm:$0xff] }
  0x7b   : > { %4809 = vmatprep.mubr.msk.f32.mxu1 %vm265_vm1, %v5522_v41 }
  0x7d   : > { %4860 = vmatmul.mubr.msk.f32.vlgmr.msra.gmra.mxu0 %vm265_vm1, %v5378_v11  ;;  %v5993_v11 = vld [vmem:[%s5343_s9 + $0x189] sm:$0xff] }
  0x7e   : > { %4810 = vmatmul.mubr.msk.f32.vlgmr.msra.gmra.mxu1 %vm265_vm1, %v5544_v45  ;;  %4958 = vmatpush3.msk.msra.mxu0 %vm362_vm0, %v5537_v44  ;;  %6968 = vst [vmem:[#allocation5_spill] sm:$0xff] %v5993_v11  ;;  %v6986_v44 = vld [vmem:[#allocation23_spill] sm:$0xff]  ;;  %v6987_v45 = vld [vmem:[#allocation24_spill] sm:$0xff] }
  0x7f   : > { %4908 = vmatpush3.msk.msra.mxu1 %vm362_vm0, %v5532_v43  ;;  %4812 = vmatprep.mubr.msk.f32.mxu1 %vm265_vm1, %v5554_v47 }
  0x80   : > { %4862 = vmatprep.mubr.msk.f32.mxu0 %vm265_vm1, %v5388_v13  ;;  %5007 = vmatprep.subr.msk.mxu1 %vm362_vm0, %v5852_v36 }
  0x81   : > { %5057 = vmatprep.subr.msk.mxu0 %vm362_vm0, %v5857_v10  ;;  %4863 = vmatmul.mubr.msk.f32.gmra.mxu0 %vm265_vm1, %v5406_v15 }
  0x82   : > { %4813 = vmatmul.mubr.msk.f32.gmra.mxu1 %vm265_vm1, %v5572_v49  ;;  %4865 = vmatprep.mubr.msk.f32.mxu0 %vm265_vm1, %v5412_v17 }
  0x83   : > { %4815 = vmatprep.mubr.msk.f32.mxu1 %vm265_vm1, %v5578_v51 }
  0x85   : > { %4866 = vmatmul.mubr.msk.f32.gmra.mxu0 %vm265_vm1, %v5426_v19 }
  0x86   : > { %4816 = vmatmul.mubr.msk.f32.gmra.mxu1 %vm265_vm1, %v5592_v53  ;;  %4868 = vmatprep.mubr.msk.f32.mxu0 %vm265_vm1, %v5432_v21 }
  0x87   : > { %4818 = vmatprep.mubr.msk.f32.mxu1 %vm265_vm1, %v5598_v55 }
  0x89   : > { %4869 = vmatmul.mubr.msk.f32.gmra.mxu0 %vm265_vm1, %v5446_v23 }
  0x8a   : > { %4819 = vmatmul.mubr.msk.f32.gmra.mxu1 %vm265_vm1, %v5612_v57  ;;  %4871 = vmatprep.mubr.msk.f32.mxu0 %vm265_vm1, %v5452_v25 }
  0x8b   : > { %4821 = vmatprep.mubr.msk.f32.mxu1 %vm265_vm1, %v5618_v59 }
  0x8d   : > { %4872 = vmatmul.mubr.msk.f32.gmra.mxu0 %vm265_vm1, %v5466_v27 }
  0x8e   : > { %4822 = vmatmul.mubr.msk.f32.gmra.mxu1 %vm265_vm1, %v5632_v61  ;;  %4874 = vmatprep.mubr.msk.f32.mxu0 %vm265_vm1, %v5472_v29  ;;  %v6978_v29 = vld [vmem:[#allocation15_spill] sm:$0xff] }
  0x8f   : > { %4824 = vmatprep.mubr.msk.f32.mxu1 %vm265_vm1, %v5638_v63 }
  0x91   : > { %4875 = vmatmul.mubr.msk.f32.gmra.mxu0 %vm265_vm1, %v5486_v31  ;;  %v6980_v31 = vld [vmem:[#allocation17_spill] sm:$0xff] }
  0x92   : > { %4825 = vmatmul.mubr.msk.f32.gmra.mxu1 %vm265_vm1, %v5652_v1  ;;  %4877 = vmatprep.mubr.msk.f32.mxu0 %vm265_vm1, %v5492_v33  ;;  %v6982_v33 = vld [vmem:[#allocation19_spill] sm:$0xff] }
  0x93   : > { %4827 = vmatprep.mubr.msk.f32.mxu1 %vm265_vm1, %v5658_v3 }
  0x95   : > { %4878 = vmatmul.mubr.msk.f32.gmra.mxu0 %vm265_vm1, %v5506_v35  ;;  %v6984_v35 = vld [vmem:[#allocation21_spill] sm:$0xff] }
  0x96   : > { %4828 = vmatmul.mubr.msk.f32.gmra.mxu1 %vm265_vm1, %v5672_v9  ;;  %4880 = vmatprep.mubr.msk.f32.mxu0 %vm265_vm1, %v5347_v4  ;;  %v5976_v4 = vld [vmem:[%s5343_s9 + $0x180] sm:$0xff] }
  0x97   : > { %4830 = vmatprep.mubr.msk.f32.mxu1 %vm265_vm1, %v5678_v37 }
  0x99   : > { %4881 = vmatmul.mubr.msk.f32.gmra.mxu0 %vm265_vm1, %v5354_v6  ;;  %v5979_v6 = vld [vmem:[%s5343_s9 + $0x181] sm:$0xff] }
  0x9a   : > { %4831 = vmatmul.mubr.msk.f32.gmra.mxu1 %vm265_vm1, %v5692_v39  ;;  %4883 = vmatprep.mubr.msk.f32.mxu0 %vm265_vm1, %v5360_v8  ;;  %6966 = vst [vmem:[#allocation36_spill] sm:$0xff] %v5979_v6  ;;  %v5990_v8 = vld [vmem:[%s5343_s9 + $0x188] sm:$0xff] }
  0x9b   : > { %4833 = vmatprep.mubr.msk.f32.mxu1 %vm265_vm1, %v5698_v5 }
  0x9d   : > { %4884 = vmatmul.mubr.msk.f32.gmra.mxu0 %vm265_vm1, %v5381_v12  ;;  %v6969_v12 = vld [vmem:[#allocation6_spill] sm:$0xff] }
  0x9e   : > { %4834 = vmatmul.mubr.msk.f32.gmra.mxu1 %vm265_vm1, %v5712_v38  ;;  %4886 = vmatprep.mubr.msk.f32.mxu0 %vm265_vm1, %v5391_v14  ;;  %v6970_v14 = vld [vmem:[#allocation7_spill] sm:$0xff] }
  0x9f   : > { %4836 = vmatprep.mubr.msk.f32.mxu1 %vm265_vm1, %v5718_v0 }
  0xa1   : > { %4887 = vmatmul.mubr.msk.f32.gmra.mxu0 %vm265_vm1, %v5409_v16  ;;  %v6971_v16 = vld [vmem:[#allocation8_spill] sm:$0xff] }
  0xa2   : > { %4837 = vmatmul.mubr.msk.f32.gmra.mxu1 %vm265_vm1, %v5732_v2  ;;  %4889 = vmatprep.mubr.msk.f32.mxu0 %vm265_vm1, %v5415_v18  ;;  %v6972_v18 = vld [vmem:[#allocation9_spill] sm:$0xff] }
  0xa3   : > { %4839 = vmatprep.mubr.msk.f32.mxu1 %vm265_vm1, %v5738_v60 }
  0xa5   : > { %4890 = vmatmul.mubr.msk.f32.gmra.mxu0 %vm265_vm1, %v5429_v20  ;;  %v6973_v20 = vld [vmem:[#allocation10_spill] sm:$0xff] }
  0xa6   : > { %4840 = vmatmul.mubr.msk.f32.gmra.mxu1 %vm265_vm1, %v5752_v62  ;;  %4892 = vmatprep.mubr.msk.f32.mxu0 %vm265_vm1, %v5435_v22  ;;  %v6974_v22 = vld [vmem:[#allocation11_spill] sm:$0xff] }
  0xa7   : > { %4842 = vmatprep.mubr.msk.f32.mxu1 %vm265_vm1, %v5758_v56 }
  0xa9   : > { %4893 = vmatmul.mubr.msk.f32.gmra.mxu0 %vm265_vm1, %v5449_v24  ;;  %v6975_v24 = vld [vmem:[#allocation12_spill] sm:$0xff] }
  0xaa   : > { %4843 = vmatmul.mubr.msk.f32.gmra.mxu1 %vm265_vm1, %v5772_v58  ;;  %4895 = vmatprep.mubr.msk.f32.mxu0 %vm265_vm1, %v5455_v26  ;;  %v6976_v26 = vld [vmem:[#allocation13_spill] sm:$0xff] }
  0xab   : > { %4845 = vmatprep.mubr.msk.f32.mxu1 %vm265_vm1, %v5778_v52 }
  0xad   : > { %4896 = vmatmul.mubr.msk.f32.gmra.mxu0 %vm265_vm1, %v5469_v28  ;;  %v6977_v28 = vld [vmem:[#allocation14_spill] sm:$0xff] }
  0xae   : > { %4846 = vmatmul.mubr.msk.f32.gmra.mxu1 %vm265_vm1, %v5792_v54  ;;  %4898 = vmatprep.mubr.msk.f32.mxu0 %vm265_vm1, %v5475_v30  ;;  %v6979_v30 = vld [vmem:[#allocation16_spill] sm:$0xff] }
  0xaf   : > { %4848 = vmatprep.mubr.msk.f32.mxu1 %vm265_vm1, %v5798_v48 }
  0xb1   : > { %4899 = vmatmul.mubr.msk.f32.gmra.mxu0 %vm265_vm1, %v5489_v32  ;;  %v6981_v32 = vld [vmem:[#allocation18_spill] sm:$0xff] }
  0xb2   : > { %4849 = vmatmul.mubr.msk.f32.gmra.mxu1 %vm265_vm1, %v5812_v50  ;;  %4901 = vmatprep.mubr.msk.f32.mxu0 %vm265_vm1, %v5495_v34  ;;  %v6983_v34 = vld [vmem:[#allocation20_spill] sm:$0xff] }
  0xb3   : > { %4851 = vmatprep.mubr.msk.f32.mxu1 %vm265_vm1, %v5818_v42 }
  0xb5   : > { %4902 = vmatmul.mubr.msk.f32.gmra.mxu0 %vm265_vm1, %v6967_v7 }
  0xb6   : > { %4852 = vmatmul.mubr.msk.f32.gmra.mxu1 %vm265_vm1, %v5832_v46  ;;  %4904 = vmatprep.mubr.msk.f32.mxu0 %vm265_vm1, %v5979_v6  ;;  %v4185_v6 = vld [vmem:[%s5343_s9 + $0x198] sm:$0xff] }
  0xb7   : > { %4854 = vmatprep.mubr.msk.f32.mxu1 %vm265_vm1, %v5976_v4 }
  0xb9   : > { %4905 = vmatmul.mubr.msk.f32.gmra.mxu0 %vm265_vm1, %v5993_v11  ;;  %v6168_v11 = vld [vmem:[%s5343_s9 + $0x182] sm:$0xff] }
  0xba   : > { %4855 = vmatmul.mubr.msk.f32.gmra.mxu1 %vm265_vm1, %v5990_v8  ;;  %4959 = vmatprep.mubr.msk.f32.mxu0 %vm265_vm1, %v5554_v47  ;;  %7001 = vst [vmem:[#allocation10_spill] sm:$0xff] %v6168_v11 }
  0xbb   : > { %4909 = vmatprep.mubr.msk.f32.mxu1 %vm265_vm1, %v6969_v12 }
  0xbd   : > { %4960 = vmatmul.mubr.msk.f32.vlgmr.msra.gmra.mxu0 %vm265_vm1, %v5572_v49 }
  0xbe   : > { %4910 = vmatmul.mubr.msk.f32.vlgmr.msra.gmra.mxu1 %vm265_vm1, %v6970_v14  ;;  %5058 = vmatpush3.msk.msra.mxu0 %vm362_vm0, %v5857_v10 }
  0xbf   : > { %5008 = vmatpush3.msk.msra.mxu1 %vm362_vm0, %v5852_v36  ;;  %4912 = vmatprep.mubr.msk.f32.mxu1 %vm265_vm1, %v6971_v16  ;;  %v6985_v36 = vld [vmem:[#allocation22_spill] sm:$0xff] }
  0xc0   : > { %4962 = vmatprep.mubr.msk.f32.mxu0 %vm265_vm1, %v5578_v51 }
  0xc1   : > { %4963 = vmatmul.mubr.msk.f32.gmra.mxu0 %vm265_vm1, %v5592_v53 }
  0xc2   : > { %4913 = vmatmul.mubr.msk.f32.gmra.mxu1 %vm265_vm1, %v6972_v18  ;;  %4965 = vmatprep.mubr.msk.f32.mxu0 %vm265_vm1, %v5598_v55  ;;  %v6988_v55 = vld [vmem:[#allocation25_spill] sm:$0xff] }
  0xc3   : > { %4915 = vmatprep.mubr.msk.f32.mxu1 %vm265_vm1, %v6973_v20 }
  0xc5   : > { %4966 = vmatmul.mubr.msk.f32.gmra.mxu0 %vm265_vm1, %v5612_v57  ;;  %v6989_v57 = vld [vmem:[#allocation26_spill] sm:$0xff] }
  0xc6   : > { %4916 = vmatmul.mubr.msk.f32.gmra.mxu1 %vm265_vm1, %v6974_v22  ;;  %4968 = vmatprep.mubr.msk.f32.mxu0 %vm265_vm1, %v5618_v59 }
  0xc7   : > { %4918 = vmatprep.mubr.msk.f32.mxu1 %vm265_vm1, %v6975_v24 }
  0xc9   : > { %4969 = vmatmul.mubr.msk.f32.gmra.mxu0 %vm265_vm1, %v5632_v61 }
  0xca   : > { %4919 = vmatmul.mubr.msk.f32.gmra.mxu1 %vm265_vm1, %v6976_v26  ;;  %4971 = vmatprep.mubr.msk.f32.mxu0 %vm265_vm1, %v5638_v63 }
  0xcb   : > { %4921 = vmatprep.mubr.msk.f32.mxu1 %vm265_vm1, %v6977_v28 }
  0xcd   : > { %4972 = vmatmul.mubr.msk.f32.gmra.mxu0 %vm265_vm1, %v5652_v1 }
  0xce   : > { %4922 = vmatmul.mubr.msk.f32.gmra.mxu1 %vm265_vm1, %v6978_v29  ;;  %4974 = vmatprep.mubr.msk.f32.mxu0 %vm265_vm1, %v5658_v3 }
  0xcf   : > { %4924 = vmatprep.mubr.msk.f32.mxu1 %vm265_vm1, %v6979_v30 }
  0xd1   : > { %4975 = vmatmul.mubr.msk.f32.gmra.mxu0 %vm265_vm1, %v5672_v9 }
  0xd2   : > { %4925 = vmatmul.mubr.msk.f32.gmra.mxu1 %vm265_vm1, %v6980_v31  ;;  %4977 = vmatprep.mubr.msk.f32.mxu0 %vm265_vm1, %v5678_v37 }
  0xd3   : > { %4927 = vmatprep.mubr.msk.f32.mxu1 %vm265_vm1, %v6981_v32 }
  0xd5   : > { %4978 = vmatmul.mubr.msk.f32.gmra.mxu0 %vm265_vm1, %v5692_v39 }
  0xd6   : > { %4928 = vmatmul.mubr.msk.f32.gmra.mxu1 %vm265_vm1, %v6982_v33  ;;  %4980 = vmatprep.mubr.msk.f32.mxu0 %vm265_vm1, %v5698_v5  ;;  %v6992_v5 = vld [vmem:[#allocation29_spill] sm:$0xff] }
  0xd7   : > { %4930 = vmatprep.mubr.msk.f32.mxu1 %vm265_vm1, %v6983_v34 }
  0xd9   : > { %4981 = vmatmul.mubr.msk.f32.gmra.mxu0 %vm265_vm1, %v5712_v38  ;;  %v6995_v38 = vld [vmem:[#allocation31_spill] sm:$0xff] }
  0xda   : > { %4931 = vmatmul.mubr.msk.f32.gmra.mxu1 %vm265_vm1, %v6984_v35  ;;  %4983 = vmatprep.mubr.msk.f32.mxu0 %vm265_vm1, %v5718_v0  ;;  %v6990_v0 = vld [vmem:[#allocation27_spill] sm:$0xff] }
  0xdb   : > { %4933 = vmatprep.mubr.msk.f32.mxu1 %vm265_vm1, %v6985_v36 }
  0xdd   : > { %v6071_v41 = vpop.f32.mrf.mxu0  ;;  %4984 = vmatmul.mubr.msk.f32.gmra.mxu0 %vm265_vm1, %v5732_v2 }
  0xde   : > { %v6073_v43 = vpop.f32.mrf.mxu1  ;;  %4934 = vmatmul.mubr.msk.f32.gmra.mxu1 %vm265_vm1, %v6986_v44  ;;  %4986 = vmatprep.mubr.msk.f32.mxu0 %vm265_vm1, %v5738_v60 }
  0xdf   : > { %4936 = vmatprep.mubr.msk.f32.mxu1 %vm265_vm1, %v6987_v45  ;;  %v6083_v47 = vpop.f32.mrf.mxu0 }
  0xe0   : > { %v6085_v49 = vpop.f32.mrf.mxu1 }
  0xe1   : > { %v6087_v51 = vpop.f32.mrf.mxu0  ;;  %4987 = vmatmul.mubr.msk.f32.gmra.mxu0 %vm265_vm1, %v5752_v62  ;;  %v6991_v62 = vld [vmem:[#allocation28_spill] sm:$0xff] }
  0xe2   : > { %v6089_v53 = vpop.f32.mrf.mxu1  ;;  %4937 = vmatmul.mubr.msk.f32.gmra.mxu1 %vm265_vm1, %v6988_v55  ;;  %4989 = vmatprep.mubr.msk.f32.mxu0 %vm265_vm1, %v5758_v56 }
  0xe3   : > { %4939 = vmatprep.mubr.msk.f32.mxu1 %vm265_vm1, %v6989_v57  ;;  %v6099_v59 = vpop.f32.mrf.mxu0 }
  0xe4   : > { %v6101_v60 = vpop.f32.mrf.mxu1 }
  0xe5   : > { %v6103_v61 = vpop.f32.mrf.mxu0  ;;  %4990 = vmatmul.mubr.msk.f32.gmra.mxu0 %vm265_vm1, %v5772_v58  ;;  %v6993_v58 = vld [vmem:[#allocation30_spill] sm:$0xff] }
  0xe6   : > { %v6105_v63 = vpop.f32.mrf.mxu1  ;;  %4940 = vmatmul.mubr.msk.f32.gmra.mxu1 %vm265_vm1, %v6990_v0  ;;  %4992 = vmatprep.mubr.msk.f32.mxu0 %vm265_vm1, %v5778_v52 }
  0xe7   : > { %4942 = vmatprep.mubr.msk.f32.mxu1 %vm265_vm1, %v6991_v62  ;;  %v6115_v56 = vpop.f32.mrf.mxu0 }
  0xe8   : > { %v6117_v1 = vpop.f32.mrf.mxu1 }
  0xe9   : > { %v6119_v2 = vpop.f32.mrf.mxu0  ;;  %4993 = vmatmul.mubr.msk.f32.gmra.mxu0 %vm265_vm1, %v5792_v54  ;;  %v6996_v54 = vld [vmem:[#allocation32_spill] sm:$0xff] }
  0xea   : > { %v6121_v3 = vpop.f32.mrf.mxu1  ;;  %4943 = vmatmul.mubr.msk.f32.gmra.mxu1 %vm265_vm1, %v6992_v5  ;;  %4995 = vmatprep.mubr.msk.f32.mxu0 %vm265_vm1, %v5798_v48 }
  0xeb   : > { %4945 = vmatprep.mubr.msk.f32.mxu1 %vm265_vm1, %v6993_v58  ;;  %v6131_v52 = vpop.f32.mrf.mxu0 }
  0xec   : > { %v6133_v9 = vpop.f32.mrf.mxu1 }
  0xed   : > { %v6135_v10 = vpop.f32.mrf.mxu0  ;;  %4996 = vmatmul.mubr.msk.f32.gmra.mxu0 %vm265_vm1, %v5812_v50  ;;  %v6999_v50 = vld [vmem:[#allocation34_spill] sm:$0xff] }
  0xee   : > { %v6137_v37 = vpop.f32.mrf.mxu1  ;;  %4946 = vmatmul.mubr.msk.f32.gmra.mxu1 %vm265_vm1, %v6995_v38  ;;  %4998 = vmatprep.mubr.msk.f32.mxu0 %vm265_vm1, %v5818_v42 }
  0xef   : > { %6994 = vst [vmem:[#allocation6_spill] sm:$0xff] %v6137_v37  ;;  %4948 = vmatprep.mubr.msk.f32.mxu1 %vm265_vm1, %v6996_v54  ;;  %v6147_v48 = vpop.f32.mrf.mxu0  ;;  %v7003_v37 = vld [vmem:[#allocation35_spill] sm:$0xff] }
  0xf0   : > { %v6149_v39 = vpop.f32.mrf.mxu1 }
  0xf1   : > { %6997 = vst [vmem:[#allocation7_spill] sm:$0xff] %v6149_v39  ;;  %v6151_v7 = vpop.f32.mrf.mxu0  ;;  %4999 = vmatmul.mubr.msk.f32.gmra.mxu0 %vm265_vm1, %v5832_v46  ;;  %v6183_v46 = vld [vmem:[%s5343_s9 + $0x18a] sm:$0xff] }
  0xf2   : > { %v6153_v12 = vpop.f32.mrf.mxu1  ;;  %4949 = vmatmul.mubr.msk.f32.gmra.mxu1 %vm265_vm1, %v5815_v40  ;;  %5001 = vmatprep.mubr.msk.f32.mxu0 %vm265_vm1, %v5976_v4  ;;  %7004 = vst [vmem:[#allocation12_spill] sm:$0xff] %v6183_v46  ;;  %v4186_v4 = vld [vmem:[%s5343_s9 + $0x1a0] sm:$0xff] }
  0xf3   : > { %6998 = vst [vmem:[#allocation8_spill] sm:$0xff] %v6153_v12  ;;  %4951 = vmatprep.mubr.msk.f32.mxu1 %vm265_vm1, %v6999_v50  ;;  %v6163_v42 = vpop.f32.mrf.mxu0 }
  0xf4   : > { %v6165_v14 = vpop.f32.mrf.mxu1 }
  0xf5   : > { %7000 = vst [vmem:[#allocation9_spill] sm:$0xff] %v6165_v14  ;;  %v6171_v12 = vpop.f32.mrf.mxu0  ;;  %5002 = vmatmul.mubr.msk.f32.gmra.mxu0 %vm265_vm1, %v5990_v8 }
  0xf6   : > { %v6173_v39 = vpop.f32.mrf.mxu1  ;;  %4952 = vmatmul.mubr.msk.f32.gmra.mxu1 %vm265_vm1, %v7003_v37  ;;  %5004 = vmatprep.mubr.msk.f32.mxu0 %vm265_vm1, %v4185_v6 }
  0xf7   : > { %7002 = vst [vmem:[#allocation11_spill] sm:$0xff] %v6173_v39  ;;  %4954 = vmatprep.mubr.msk.f32.mxu1 %vm265_vm1, %v6168_v11  ;;  %v6186_v50 = vpop.f32.mrf.mxu0 }
  0xf8   : > { %v6188_v14 = vpop.f32.mrf.mxu1 }
  0xf9   : > { %7005 = vst [vmem:[#allocation13_spill] sm:$0xff] %v6188_v14  ;;  %v6190_v40 = vpop.f32.mrf.mxu0  ;;  %5005 = vmatmul.mubr.msk.f32.gmra.mxu0 %vm265_vm1, %v4186_v4 }
  0xfa   : > { %v6192_v39 = vpop.f32.mrf.mxu1  ;;  %4955 = vmatmul.mubr.msk.f32.gmra.mxu1 %vm265_vm1, %v6183_v46  ;;  %5059 = vmatprep.mubr.msk.f32.mxu0 %vm265_vm1, %v6971_v16 }
  0xfb   : > { %7006 = vst [vmem:[#allocation14_spill] sm:$0xff] %v6192_v39  ;;  %5009 = vmatprep.mubr.msk.f32.mxu1 %vm265_vm1, %v5388_v13  ;;  %v6201_v6 = vpop.f32.mrf.mxu0 }
  0xfc   : > { %v6203_v8 = vpop.f32.mrf.mxu1 }
  0xfd   : > { %7007 = vst [vmem:[#allocation15_spill] sm:$0xff] %v6203_v8  ;;  %v4761_v14 = vpop.f32.mrf.mxu0  ;;  %5060 = vmatmul.mubr.msk.f32.vlgmr.msra.gmra.mxu0 %vm265_vm1, %v6972_v18 }
  0xfe   : > { %v4711_v37 = vpop.f32.mrf.mxu1  ;;  %5010 = vmatmul.mubr.msk.f32.vlgmr.msra.gmra.mxu1 %vm265_vm1, %v5406_v15  ;;  %5062 = vmatprep.mubr.msk.f32.mxu0 %vm265_vm1, %v6973_v20 }
  0xff   : > { %v762_v4 = vadd.f32 %v4711_v37, %v6071_v41  ;;  %5012 = vmatprep.mubr.msk.f32.mxu1 %vm265_vm1, %v5412_v17  ;;  %v1114_v16 = vpop.f32.mrf.mxu0  ;;  %v4231_v37 = vld [vmem:[%s5343_s9 + $0xa9] sm:$0xff] }
 0x100   : > { %v756_v13 = vpop.f32.mrf.mxu1 }
 0x101   : > { %v6214_v39 = vadd.f32 %v4761_v14, %v762_v4  ;;  %v757_v8 = vadd.f32 %v756_v13, %v6083_v47  ;;  %v4764_v11 = vpop.f32.mrf.mxu0  ;;  %5063 = vmatmul.mubr.msk.f32.gmra.mxu0 %vm265_vm1, %v6974_v22 }
 0x102   : > { %v4714_v46 = vpop.f32.mrf.mxu1  ;;  %5013 = vmatmul.mubr.msk.f32.gmra.mxu1 %vm265_vm1, %v5426_v19  ;;  %5065 = vmatprep.mubr.msk.f32.mxu0 %vm265_vm1, %v6975_v24 }
 0x103   : > { %v6221_v15 = vadd.f32 %v1114_v16, %v757_v8  ;;  %v772_v17 = vadd.f32 %v4714_v46, %v6087_v51  ;;  %5015 = vmatprep.mubr.msk.f32.mxu1 %vm265_vm1, %v5432_v21  ;;  %v1124_v20 = vpop.f32.mrf.mxu0  ;;  %v4229_v51 = vld [vmem:[%s5343_s9 + $0x91] sm:$0xff] }
 0x104   : > { %v766_v18 = vpop.f32.mrf.mxu1  ;;  %v4232_v16 = vld [vmem:[%s5343_s9 + $0xb1] sm:$0xff] }
 0x105   : > { %v6228_v41 = vadd.f32 %v4764_v11, %v772_v17  ;;  %v767_v19 = vadd.f32 %v766_v18, %v6099_v59  ;;  %v4767_v14 = vpop.f32.mrf.mxu0  ;;  %5066 = vmatmul.mubr.msk.f32.gmra.mxu0 %vm265_vm1, %v6976_v26  ;;  %v4233_v18 = vld [vmem:[%s5343_s9 + $0xc1] sm:$0xff] }
 0x106   : > { %v4717_v47 = vpop.f32.mrf.mxu1  ;;  %5016 = vmatmul.mubr.msk.f32.gmra.mxu1 %vm265_vm1, %v5446_v23  ;;  %5068 = vmatprep.mubr.msk.f32.mxu0 %vm265_vm1, %v6977_v28 }
 0x107   : > { %v6235_v22 = vadd.f32 %v1124_v20, %v767_v19  ;;  %v782_v21 = vadd.f32 %v4717_v47, %v6103_v61  ;;  %5018 = vmatprep.mubr.msk.f32.mxu1 %vm265_vm1, %v5452_v25  ;;  %v1134_v24 = vpop.f32.mrf.mxu0  ;;  %v4230_v61 = vld [vmem:[%s5343_s9 + $0x99] sm:$0xff] }
 0x108   : > { %v776_v11 = vpop.f32.mrf.mxu1 }
 0x109   : > { %v6243_v59 = vadd.f32 %v4767_v14, %v782_v21  ;;  %v777_v23 = vadd.f32 %v776_v11, %v6115_v56  ;;  %v4770_v46 = vpop.f32.mrf.mxu0  ;;  %5069 = vmatmul.mubr.msk.f32.gmra.mxu0 %vm265_vm1, %v6978_v29  ;;  %v4234_v14 = vld [vmem:[%s5343_s9 + $0xc9] sm:$0xff]  ;;  %v4235_v11 = vld [vmem:[%s5343_s9 + $0xd9] sm:$0xff] }
 0x10a   : > { %v4720_v26 = vpop.f32.mrf.mxu1  ;;  %5019 = vmatmul.mubr.msk.f32.gmra.mxu1 %vm265_vm1, %v5466_v27  ;;  %5071 = vmatprep.mubr.msk.f32.mxu0 %vm265_vm1, %v6979_v30 }
 0x10b   : > { %v6250_v25 = vadd.f32 %v1134_v24, %v777_v23  ;;  %v792_v28 = vadd.f32 %v4720_v26, %v6119_v2  ;;  %5021 = vmatprep.mubr.msk.f32.mxu1 %vm265_vm1, %v4229_v51  ;;  %v1144_v8 = vpop.f32.mrf.mxu0  ;;  %v4236_v26 = vld [vmem:[%s5343_s9 + $0xe1] sm:$0xff] }
 0x10c   : > { %v786_v56 = vpop.f32.mrf.mxu1 }
 0x10d   : > { %v6258_v4 = vadd.f32 %v4770_v46, %v792_v28  ;;  %v787_v27 = vadd.f32 %v786_v56, %v6131_v52  ;;  %v4773_v13 = vpop.f32.mrf.mxu0  ;;  %5072 = vmatmul.mubr.msk.f32.gmra.mxu0 %vm265_vm1, %v6980_v31  ;;  %v4237_v28 = vld [vmem:[%s5343_s9 + $0xf1] sm:$0xff] }
 0x10e   : > { %v4723_v29 = vpop.f32.mrf.mxu1  ;;  %5022 = vmatmul.mubr.msk.f32.gmra.mxu1 %vm265_vm1, %v4230_v61  ;;  %5074 = vmatprep.mubr.msk.f32.mxu0 %vm265_vm1, %v6981_v32 }
 0x10f   : > { %v6264_v2 = vadd.f32 %v1144_v8, %v787_v27  ;;  %v802_v30 = vadd.f32 %v4723_v29, %v6135_v10  ;;  %5024 = vmatprep.mubr.msk.f32.mxu1 %vm265_vm1, %v4231_v37  ;;  %v1154_v52 = vpop.f32.mrf.mxu0  ;;  %v4238_v37 = vld [vmem:[%s5343_s9 + $0xf9] sm:$0xff]  ;;  %v4239_v29 = vld [vmem:[%s5343_s9 + $0x109] sm:$0xff] }
 0x110   : > { %v796_v17 = vpop.f32.mrf.mxu1 }
 0x111   : > { %v6272_v20 = vadd.f32 %v4773_v13, %v802_v30  ;;  %v797_v19 = vadd.f32 %v796_v17, %v6147_v48  ;;  %v4776_v47 = vpop.f32.mrf.mxu0  ;;  %5075 = vmatmul.mubr.msk.f32.gmra.mxu0 %vm265_vm1, %v6982_v33  ;;  %v4240_v17 = vld [vmem:[%s5343_s9 + $0x111] sm:$0xff] }
 0x112   : > { %v4726_v31 = vpop.f32.mrf.mxu1  ;;  %5025 = vmatmul.mubr.msk.f32.gmra.mxu1 %vm265_vm1, %v4232_v16  ;;  %5077 = vmatprep.mubr.msk.f32.mxu0 %vm265_vm1, %v6983_v34 }
 0x113   : > { %v6278_v10 = vadd.f32 %v1154_v52, %v797_v19  ;;  %v812_v32 = vadd.f32 %v4726_v31, %v6151_v7  ;;  %5027 = vmatprep.mubr.msk.f32.mxu1 %vm265_vm1, %v4233_v18  ;;  %v1164_v48 = vpop.f32.mrf.mxu0  ;;  %v4241_v18 = vld [vmem:[%s5343_s9 + $0x121] sm:$0xff] }
 0x114   : > { %v806_v21 = vpop.f32.mrf.mxu1 }
 0x115   : > { %v6286_v24 = vadd.f32 %v4776_v47, %v812_v32  ;;  %v807_v51 = vadd.f32 %v806_v21, %v6163_v42  ;;  %v4779_v23 = vpop.f32.mrf.mxu0  ;;  %5078 = vmatmul.mubr.msk.f32.gmra.mxu0 %vm265_vm1, %v6984_v35  ;;  %v4242_v32 = vld [vmem:[%s5343_s9 + $0x129] sm:$0xff]  ;;  %v4243_v21 = vld [vmem:[%s5343_s9 + $0x139] sm:$0xff] }
 0x116   : > { %v4729_v33 = vpop.f32.mrf.mxu1  ;;  %5028 = vmatmul.mubr.msk.f32.gmra.mxu1 %vm265_vm1, %v4234_v14  ;;  %5080 = vmatprep.mubr.msk.f32.mxu0 %vm265_vm1, %v6985_v36 }
 0x117   : > { %v6292_v7 = vadd.f32 %v1164_v48, %v807_v51  ;;  %v822_v34 = vadd.f32 %v4729_v33, %v6171_v12  ;;  %5030 = vmatprep.mubr.msk.f32.mxu1 %vm265_vm1, %v4235_v11  ;;  %v1174_v42 = vpop.f32.mrf.mxu0  ;;  %v4244_v33 = vld [vmem:[%s5343_s9 + $0x141] sm:$0xff] }
 0x118   : > { %v816_v46 = vpop.f32.mrf.mxu1 }
 0x119   : > { %v6300_v61 = vadd.f32 %v4779_v23, %v822_v34  ;;  %v817_v56 = vadd.f32 %v816_v46, %v6186_v50  ;;  %v4782_v8 = vpop.f32.mrf.mxu0  ;;  %5081 = vmatmul.mubr.msk.f32.gmra.mxu0 %vm265_vm1, %v6986_v44  ;;  %v4245_v34 = vld [vmem:[%s5343_s9 + $0x151] sm:$0xff] }
 0x11a   : > { %v4732_v35 = vpop.f32.mrf.mxu1  ;;  %5031 = vmatmul.mubr.msk.f32.gmra.mxu1 %vm265_vm1, %v4236_v26  ;;  %5083 = vmatprep.mubr.msk.f32.mxu0 %vm265_vm1, %v6987_v45 }
 0x11b   : > { %v6306_v12 = vadd.f32 %v1174_v42, %v817_v56  ;;  %v832_v36 = vadd.f32 %v4732_v35, %v6190_v40  ;;  %5033 = vmatprep.mubr.msk.f32.mxu1 %vm265_vm1, %v4237_v28  ;;  %v1184_v50 = vpop.f32.mrf.mxu0  ;;  %v4246_v28 = vld [vmem:[%s5343_s9 + $0x159] sm:$0xff]  ;;  %v4247_v35 = vld [vmem:[%s5343_s9 + $0x169] sm:$0xff] }
 0x11c   : > { %v826_v27 = vpop.f32.mrf.mxu1 }
 0x11d   : > { %v6314_v13 = vadd.f32 %v4782_v8, %v832_v36  ;;  %v827_v30 = vadd.f32 %v826_v27, %v6201_v6  ;;  %v4785_v16 = vpop.f32.mrf.mxu0  ;;  %5084 = vmatmul.mubr.msk.f32.gmra.mxu0 %vm265_vm1, %v6988_v55  ;;  %v4313_v8 = vld [vmem:[%s5343_s9 + $0x16a] sm:$0xff] }
 0x11e   : > { %v4735_v44 = vpop.f32.mrf.mxu1  ;;  %5034 = vmatmul.mubr.msk.f32.gmra.mxu1 %vm265_vm1, %v4238_v37  ;;  %5086 = vmatprep.mubr.msk.f32.mxu0 %vm265_vm1, %v6989_v57 }
 0x11f   : > { %v6320_v40 = vadd.f32 %v1184_v50, %v827_v30  ;;  %v842_v45 = vadd.f32 %v4735_v44, %v6073_v43  ;;  %5036 = vmatprep.mubr.msk.f32.mxu1 %vm265_vm1, %v4239_v29  ;;  %v1194_v6 = vpop.f32.mrf.mxu0  ;;  %v4248_v30 = vld [vmem:[%s5343_s9 + $0x171] sm:$0xff] }
 0x120   : > { %v836_v52 = vpop.f32.mrf.mxu1  ;;  %v4314_v44 = vld [vmem:[%s5343_s9 + $0x172] sm:$0xff] }
 0x121   : > { %v6328_v19 = vadd.f32 %v4785_v16, %v842_v45  ;;  %v837_v31 = vadd.f32 %v836_v52, %v6085_v49  ;;  %v4788_v47 = vpop.f32.mrf.mxu0  ;;  %5087 = vmatmul.mubr.msk.f32.gmra.mxu0 %vm265_vm1, %v6990_v0 }
 0x122   : > { %v4738_v55 = vpop.f32.mrf.mxu1  ;;  %5037 = vmatmul.mubr.msk.f32.gmra.mxu1 %vm265_vm1, %v4240_v17  ;;  %5089 = vmatprep.mubr.msk.f32.mxu0 %vm265_vm1, %v6991_v62  ;;  %v7010_v17 = vld [vmem:[#allocation7_spill] sm:$0xff] }
 0x123   : > { %v6334_v43 = vadd.f32 %v1194_v6, %v837_v31  ;;  %v852_v57 = vadd.f32 %v4738_v55, %v6089_v53  ;;  %5039 = vmatprep.mubr.msk.f32.mxu1 %vm265_vm1, %v4241_v18  ;;  %v1204_v49 = vpop.f32.mrf.mxu0  ;;  %v7011_v55 = vld [vmem:[#allocation8_spill] sm:$0xff] }
 0x124   : > { %v846_v14 = vpop.f32.mrf.mxu1 }
 0x125   : > { %v6342_v48 = vadd.f32 %v4788_v47, %v852_v57  ;;  %v847_v11 = vadd.f32 %v846_v14, %v6101_v60  ;;  %v4791_v51 = vpop.f32.mrf.mxu0  ;;  %5090 = vmatmul.mubr.msk.f32.gmra.mxu0 %vm265_vm1, %v6992_v5  ;;  %v7012_v57 = vld [vmem:[#allocation36_spill] sm:$0xff] }
 0x126   : > { %v4741_v0 = vpop.f32.mrf.mxu1  ;;  %5040 = vmatmul.mubr.msk.f32.gmra.mxu1 %vm265_vm1, %v4242_v32  ;;  %5092 = vmatprep.mubr.msk.f32.mxu0 %vm265_vm1, %v6993_v58  ;;  %v7013_v32 = vld [vmem:[#allocation10_spill] sm:$0xff] }
 0x127   : > { %v6348_v53 = vadd.f32 %v1204_v49, %v847_v11  ;;  %v862_v62 = vadd.f32 %v4741_v0, %v6105_v63  ;;  %5042 = vmatprep.mubr.msk.f32.mxu1 %vm265_vm1, %v4243_v21  ;;  %v1214_v60 = vpop.f32.mrf.mxu0  ;;  %v4251_v21 = vld [vmem:[%s5343_s9 + $0x199] sm:$0xff] }
 0x128   : > { %v856_v23 = vpop.f32.mrf.mxu1  ;;  %v4317_v11 = vld [vmem:[%s5343_s9 + $0x19a] sm:$0xff] }
 0x129   : > { %v6356_v26 = vadd.f32 %v4791_v51, %v862_v62  ;;  %v857_v5 = vadd.f32 %v856_v23, %v6117_v1  ;;  %v4794_v42 = vpop.f32.mrf.mxu0  ;;  %5093 = vmatmul.mubr.msk.f32.gmra.mxu0 %vm265_vm1, %v6995_v38  ;;  %v7014_v51 = vld [vmem:[#allocation9_spill] sm:$0xff] }
 0x12a   : > { %v4744_v46 = vpop.f32.mrf.mxu1  ;;  %5043 = vmatmul.mubr.msk.f32.gmra.mxu1 %vm265_vm1, %v4244_v33  ;;  %5095 = vmatprep.mubr.msk.f32.mxu0 %vm265_vm1, %v6996_v54  ;;  %v7009_v54 = vld [vmem:[#allocation6_spill] sm:$0xff] }
 0x12b   : > { %v6362_v63 = vadd.f32 %v1214_v60, %v857_v5  ;;  %v872_v58 = vadd.f32 %v4744_v46, %v6121_v3  ;;  %5045 = vmatprep.mubr.msk.f32.mxu1 %vm265_vm1, %v4245_v34  ;;  %v1224_v56 = vpop.f32.mrf.mxu0  ;;  %v7008_v3 = vld [vmem:[#allocation33_spill] sm:$0xff]  ;;  %v7016_v34 = vld [vmem:[#allocation12_spill] sm:$0xff]  ;;  %v7017_v46 = vld [vmem:[#allocation11_spill] sm:$0xff] }
 0x12c   : > { %v866_v1 = vpop.f32.mrf.mxu1  ;;  %v7015_v60 = vld [vmem:[#allocation5_spill] sm:$0xff] }
 0x12d   : > { %v6371_v36 = vadd.f32 %v4794_v42, %v872_v58  ;;  %v867_v38 = vadd.f32 %v866_v1, %v6133_v9  ;;  %v4797_v27 = vpop.f32.mrf.mxu0  ;;  %5096 = vmatmul.mubr.msk.f32.gmra.mxu0 %vm265_vm1, %v7008_v3  ;;  %v4252_v58 = vld [vmem:[%s5343_s9 + $0x1a1] sm:$0xff] }
 0x12e   : > { %v4747_v37 = vpop.f32.mrf.mxu1  ;;  %5046 = vmatmul.mubr.msk.f32.gmra.mxu1 %vm265_vm1, %v4246_v28  ;;  %5098 = vmatprep.mubr.msk.f32.mxu0 %vm265_vm1, %v4313_v8  ;;  %v4318_v28 = vld [vmem:[%s5343_s9 + $0x1a2] sm:$0xff]  ;;  %s6675_s9 = scalar_lea.vmem [#allocation2], %s3854_s8 }
 0x12f   : > { %v6377_v50 = vadd.f32 %v1224_v56, %v867_v38  ;;  %v882_v29 = vadd.f32 %v4747_v37, %v7009_v54  ;;  %5048 = vmatprep.mubr.msk.f32.mxu1 %vm265_vm1, %v4247_v35  ;;  %v1234_v16 = vpop.f32.mrf.mxu0  ;;  %v7018_v8 = vld [vmem:[#allocation13_spill] sm:$0xff]  ;;  %v7019_v54 = vld [vmem:[#allocation14_spill] sm:$0xff]  ;;  %s3767_s11 = sshll.u32 %s6675_s9, 4  ;;  %s6818_s11 = int_to_ptr.vmem [resolvable:$true] %s3767_s11 }
 0x130   : > { %v876_v9 = vpop.f32.mrf.mxu1  ;;  %s5167_s23 = scalar_lea.vmem %s6818_s11, 4096  ;;  %p5174_p1 = scmp.lt.s32.totalorder %s6818_s11, %s5172_s27 }
 0x131   : > { %v6384_v45 = vadd.f32 %v4797_v27, %v882_v29  ;;  %v877_v52 = vadd.f32 %v876_v9, %v7010_v17  ;;  %v4800_v18 = vpop.f32.mrf.mxu0  ;;  %5099 = vmatmul.mubr.msk.f32.gmra.mxu0 %vm265_vm1, %v4314_v44  ;;  %p5168_p12 = scmp.ne.s32.totalorder %s6818_s11, %s5167_s23  ;;  %p5175_p2 = scmp.lt.s32.totalorder %s5173_s28, %s5167_s23 }
 0x132   : > { %v4750_v6 = vpop.f32.mrf.mxu1  ;;  %5049 = vmatmul.mubr.msk.f32.gmra.mxu1 %vm265_vm1, %v4248_v30  ;;  %5101 = vmatprep.mubr.msk.f32.mxu0 %vm265_vm1, %v7013_v32 }
 0x133   : > { %v6389_v31 = vadd.f32 %v1234_v16, %v877_v52  ;;  %v892_v47 = vadd.f32 %v4750_v6, %v7011_v55  ;;  %5051 = vmatprep.mubr.msk.f32.mxu1 %vm265_vm1, %v7012_v57  ;;  %v1244_v49 = vpop.f32.mrf.mxu0  ;;  %v7020_v16 = vld [vmem:[#allocation15_spill] sm:$0xff]  ;;  %p5169_p13 = pnand %p5168_p12, %p5308_p4  ;;  %p5176_p3 = por %p5175_p2, %p5174_p1 }
 0x134   : > { %v886_v14 = vpop.f32.mrf.mxu1 }
 0x135   : > { %v6398_v0 = vadd.f32 %v4800_v18, %v892_v47  ;;  %v887_v62 = vadd.f32 %v886_v14, %v7014_v51  ;;  %v4803_v23 = vpop.f32.mrf.mxu0  ;;  %5102 = vmatmul.mubr.msk.f32.gmra.mxu0 %vm265_vm1, %v7016_v34  ;;  %p5170_p0 = pneg %p5169_p13 }
 0x136   : > { %v4753_v33 = vpop.f32.mrf.mxu1  ;;  %5052 = vmatmul.mubr.msk.f32.gmra.mxu1 %vm265_vm1, %v7015_v60  ;;  %5104 = vmatprep.mubr.msk.f32.mxu0 %vm265_vm1, %v4317_v11 }
 0x137   : > { %v6405_v5 = vadd.f32 %v1244_v49, %v887_v62  ;;  %v902_v42 = vadd.f32 %v4753_v33, %v7017_v46  ;;  %5054 = vmatprep.mubr.msk.f32.mxu1 %vm265_vm1, %v4251_v21  ;;  %v1254_v56 = vpop.f32.mrf.mxu0  ;;  %p5177_p5 = pnand %p5176_p3, %p5170_p0 }
 0x138   : > { %v896_v1 = vpop.f32.mrf.mxu1 }
 0x139   : > { %v6412_v35 = vadd.f32 %v4803_v23, %v902_v42  ;;  %v897_v38 = vadd.f32 %v896_v1, %v7018_v8  ;;  %v4806_v27 = vpop.f32.mrf.mxu0  ;;  %5105 = vmatmul.mubr.msk.f32.gmra.mxu0 %vm265_vm1, %v4318_v28 }
 0x13a   : > { %v4756_v37 = vpop.f32.mrf.mxu1  ;;  %5055 = vmatmul.mubr.msk.f32.gmra.mxu1 %vm265_vm1, %v4252_v58 }
 0x13b   : > { %v6417_v3 = vadd.f32 %v1254_v56, %v897_v38  ;;  %v912_v29 = vadd.f32 %v4756_v37, %v7019_v54  ;;  %v1264_v44 = vpop.f32.mrf.mxu0 }
 0x13c   : > { %v906_v30 = vpop.f32.mrf.mxu1 }
 0x13d   : > { %v6420_v9 = vadd.f32 %v4806_v27, %v912_v29  ;;  %v907_v17 = vadd.f32 %v906_v30, %v7020_v16  ;;  %v4861_v6 = vpop.f32.mrf.mxu0 }
 0x13e   : > { %v4811_v52 = vpop.f32.mrf.mxu1 }
 0x13f   : > { %v6423_v18 = vadd.f32 %v1264_v44, %v907_v17  ;;  %v1665_v55 = vadd.f32 %v4811_v52, %v6214_v39  ;;  %v1895_v57 = vpop.f32.mrf.mxu0 }
 0x140   : > { %v1505_v47 = vpop.f32.mrf.mxu1 }
 0x141   : > { %v6426_v32 = vadd.f32 %v4861_v6, %v1665_v55  ;;  %v1664_v14 = vadd.f32 %v1505_v47, %v6221_v15  ;;  %v4864_v21 = vpop.f32.mrf.mxu0 }
 0x142   : > { %v4814_v49 = vpop.f32.mrf.mxu1 }
 0x143   : > { %v6429_v11 = vadd.f32 %v1895_v57, %v1664_v14  ;;  %v1667_v51 = vadd.f32 %v4814_v49, %v6228_v41  ;;  %v1905_v33 = vpop.f32.mrf.mxu0 }
 0x144   : > { %v1515_v62 = vpop.f32.mrf.mxu1 }
 0x145   : > { %v6432_v23 = vadd.f32 %v4864_v21, %v1667_v51  ;;  %v1666_v60 = vadd.f32 %v1515_v62, %v6235_v22  ;;  %v4867_v39 = vpop.f32.mrf.mxu0 }
 0x146   : > { %v4817_v34 = vpop.f32.mrf.mxu1 }
 0x147   : > { %v6435_v46 = vadd.f32 %v1905_v33, %v1666_v60  ;;  %v1669_v42 = vadd.f32 %v4817_v34, %v6243_v59  ;;  %v1915_v15 = vpop.f32.mrf.mxu0 }
 0x148   : > { %v1525_v58 = vpop.f32.mrf.mxu1 }
 0x149   : > { %v6438_v28 = vadd.f32 %v4867_v39, %v1669_v42  ;;  %v1668_v1 = vadd.f32 %v1525_v58, %v6250_v25  ;;  %v4870_v41 = vpop.f32.mrf.mxu0 }
 0x14a   : > { %v4820_v56 = vpop.f32.mrf.mxu1 }
 0x14b   : > { %v6441_v8 = vadd.f32 %v1915_v15, %v1668_v1  ;;  %v1671_v38 = vadd.f32 %v4820_v56, %v6258_v4  ;;  %v1925_v22 = vpop.f32.mrf.mxu0 }
 0x14c   : > { %v1535_v37 = vpop.f32.mrf.mxu1 }
 0x14d   : > { %v6444_v27 = vadd.f32 %v4870_v41, %v1671_v38  ;;  %v1670_v54 = vadd.f32 %v1535_v37, %v6264_v2  ;;  %v4873_v59 = vpop.f32.mrf.mxu0 }
 0x14e   : > { %v4823_v29 = vpop.f32.mrf.mxu1 }
 0x14f   : > { %v6447_v30 = vadd.f32 %v1925_v22, %v1670_v54  ;;  %v1673_v44 = vadd.f32 %v4823_v29, %v6272_v20  ;;  %v1935_v25 = vpop.f32.mrf.mxu0 }
 0x150   : > { %v1545_v16 = vpop.f32.mrf.mxu1 }
 0x151   : > { %v6450_v17 = vadd.f32 %v4873_v59, %v1673_v44  ;;  %v1672_v52 = vadd.f32 %v1545_v16, %v6278_v10  ;;  %v4876_v4 = vpop.f32.mrf.mxu0 }
 0x152   : > { %v4826_v6 = vpop.f32.mrf.mxu1 }
 0x153   : > { %v6453_v55 = vadd.f32 %v1935_v25, %v1672_v52  ;;  %v1675_v47 = vadd.f32 %v4826_v6, %v6286_v24  ;;  %v1945_v2 = vpop.f32.mrf.mxu0 }
 0x154   : > { %v1555_v57 = vpop.f32.mrf.mxu1 }
 0x155   : > { %v6456_v14 = vadd.f32 %v4876_v4, %v1675_v47  ;;  %v1674_v49 = vadd.f32 %v1555_v57, %v6292_v7  ;;  %v4879_v20 = vpop.f32.mrf.mxu0 }
 0x156   : > { %v4829_v21 = vpop.f32.mrf.mxu1 }
 0x157   : > { %v6459_v51 = vadd.f32 %v1945_v2, %v1674_v49  ;;  %v1677_v62 = vadd.f32 %v4829_v21, %v6300_v61  ;;  %v1955_v10 = vpop.f32.mrf.mxu0 }
 0x158   : > { %v1565_v33 = vpop.f32.mrf.mxu1 }
 0x159   : > { %v6462_v60 = vadd.f32 %v4879_v20, %v1677_v62  ;;  %v1676_v34 = vadd.f32 %v1565_v33, %v6306_v12  ;;  %v4882_v24 = vpop.f32.mrf.mxu0 }
 0x15a   : > { %v4832_v39 = vpop.f32.mrf.mxu1 }
 0x15b   : > { %v6465_v42 = vadd.f32 %v1955_v10, %v1676_v34  ;;  %v1679_v58 = vadd.f32 %v4832_v39, %v6314_v13  ;;  %v1965_v7 = vpop.f32.mrf.mxu0 }
 0x15c   : > { %v1575_v15 = vpop.f32.mrf.mxu1 }
 0x15d   : > { %v6468_v1 = vadd.f32 %v4882_v24, %v1679_v58  ;;  %v1678_v56 = vadd.f32 %v1575_v15, %v6320_v40  ;;  %v4885_v61 = vpop.f32.mrf.mxu0 }
 0x15e   : > { %v4835_v41 = vpop.f32.mrf.mxu1 }
 0x15f   : > { %v6471_v38 = vadd.f32 %v1965_v7, %v1678_v56  ;;  %v1681_v37 = vadd.f32 %v4835_v41, %v6328_v19  ;;  %v1975_v12 = vpop.f32.mrf.mxu0 }
 0x160   : > { %v1585_v22 = vpop.f32.mrf.mxu1 }
 0x161   : > { %v6474_v54 = vadd.f32 %v4885_v61, %v1681_v37  ;;  %v1680_v29 = vadd.f32 %v1585_v22, %v6334_v43  ;;  %v4888_v13 = vpop.f32.mrf.mxu0 }
 0x162   : > { %v4838_v59 = vpop.f32.mrf.mxu1 }
 0x163   : > { %v6477_v44 = vadd.f32 %v1975_v12, %v1680_v29  ;;  %v1683_v16 = vadd.f32 %v4838_v59, %v6342_v48  ;;  %v1985_v40 = vpop.f32.mrf.mxu0 }
 0x164   : > { %v1595_v25 = vpop.f32.mrf.mxu1 }
 0x165   : > { %v6480_v52 = vadd.f32 %v4888_v13, %v1683_v16  ;;  %v1682_v6 = vadd.f32 %v1595_v25, %v6348_v53  ;;  %v4891_v19 = vpop.f32.mrf.mxu0 }
 0x166   : > { %v4841_v4 = vpop.f32.mrf.mxu1 }
 0x167   : > { %7021 = vst [vmem:[#allocation16_spill] sm:$0xff] %v6480_v52  ;;  %v6483_v47 = vadd.f32 %v1985_v40, %v1682_v6  ;;  %v1685_v57 = vadd.f32 %v4841_v4, %v6356_v26  ;;  %v1995_v43 = vpop.f32.mrf.mxu0 }
 0x168   : > { %v1605_v2 = vpop.f32.mrf.mxu1 }
 0x169   : > { %7022 = vst [vmem:[#allocation17_spill] sm:$0xff] %v6483_v47  ;;  %v6486_v49 = vadd.f32 %v4891_v19, %v1685_v57  ;;  %v1684_v21 = vadd.f32 %v1605_v2, %v6362_v63  ;;  %v4894_v48 = vpop.f32.mrf.mxu0 }
 0x16a   : > { %v4844_v20 = vpop.f32.mrf.mxu1 }
 0x16b   : > { %7023 = vst [vmem:[#allocation18_spill] sm:$0xff] %v6486_v49  ;;  %v6489_v62 = vadd.f32 %v1995_v43, %v1684_v21  ;;  %v1687_v33 = vadd.f32 %v4844_v20, %v6371_v36  ;;  %v2005_v53 = vpop.f32.mrf.mxu0 }
 0x16c   : > { %v1615_v10 = vpop.f32.mrf.mxu1 }
 0x16d   : > { %7024 = vst [vmem:[#allocation19_spill] sm:$0xff] %v6489_v62  ;;  %v6492_v34 = vadd.f32 %v4894_v48, %v1687_v33  ;;  %v1686_v39 = vadd.f32 %v1615_v10, %v6377_v50  ;;  %v4897_v26 = vpop.f32.mrf.mxu0 }
 0x16e   : > { %v4847_v24 = vpop.f32.mrf.mxu1 }
 0x16f   : > { %7025 = vst [vmem:[#allocation20_spill] sm:$0xff] %v6492_v34  ;;  %v6495_v58 = vadd.f32 %v2005_v53, %v1686_v39  ;;  %v1689_v15 = vadd.f32 %v4847_v24, %v6384_v45  ;;  %v2015_v63 = vpop.f32.mrf.mxu0 }
 0x170   : > { %v1625_v7 = vpop.f32.mrf.mxu1 }
 0x171   : > { %7026 = vst [vmem:[#allocation21_spill] sm:$0xff] %v6495_v58  ;;  %v6498_v56 = vadd.f32 %v4897_v26, %v1689_v15  ;;  %v1688_v41 = vadd.f32 %v1625_v7, %v6389_v31  ;;  %v4900_v36 = vpop.f32.mrf.mxu0 }
 0x172   : > { %v4850_v61 = vpop.f32.mrf.mxu1 }
 0x173   : > { %7027 = vst [vmem:[#allocation22_spill] sm:$0xff] %v6498_v56  ;;  %v6501_v37 = vadd.f32 %v2015_v63, %v1688_v41  ;;  %v1691_v22 = vadd.f32 %v4850_v61, %v6398_v0  ;;  %v2025_v50 = vpop.f32.mrf.mxu0 }
 0x174   : > { %v1635_v12 = vpop.f32.mrf.mxu1 }
 0x175   : > { %7028 = vst [vmem:[#allocation23_spill] sm:$0xff] %v6501_v37  ;;  %v6504_v29 = vadd.f32 %v4900_v36, %v1691_v22  ;;  %v1690_v59 = vadd.f32 %v1635_v12, %v6405_v5  ;;  %v4903_v45 = vpop.f32.mrf.mxu0 }
 0x176   : > { %v4853_v13 = vpop.f32.mrf.mxu1 }
 0x177   : > { %7029 = vst [vmem:[#allocation24_spill] sm:$0xff] %v6504_v29  ;;  %v6507_v16 = vadd.f32 %v2025_v50, %v1690_v59  ;;  %v1693_v25 = vadd.f32 %v4853_v13, %v6412_v35  ;;  %v2035_v31 = vpop.f32.mrf.mxu0 }
 0x178   : > { %v1645_v40 = vpop.f32.mrf.mxu1 }
 0x179   : > { %7030 = vst [vmem:[#allocation25_spill] sm:$0xff] %v6507_v16  ;;  %v6510_v6 = vadd.f32 %v4903_v45, %v1693_v25  ;;  %v1692_v4 = vadd.f32 %v1645_v40, %v6417_v3  ;;  %v4906_v0 = vpop.f32.mrf.mxu0 }
 0x17a   : > { %v4856_v19 = vpop.f32.mrf.mxu1 }
 0x17b   : > { %7031 = vst [vmem:[#allocation26_spill] sm:$0xff] %v6510_v6  ;;  %v6513_v57 = vadd.f32 %v2035_v31, %v1692_v4  ;;  %v1695_v2 = vadd.f32 %v4856_v19, %v6420_v9  ;;  %v2045_v5 = vpop.f32.mrf.mxu0 }
 0x17c   : > { %v1655_v43 = vpop.f32.mrf.mxu1 }
 0x17d   : > { %7032 = vst [vmem:[#allocation27_spill] sm:$0xff] %v6513_v57  ;;  %v6516_v21 = vadd.f32 %v4906_v0, %v1695_v2  ;;  %v1694_v20 = vadd.f32 %v1655_v43, %v6423_v18  ;;  %v6519_v35 = vpop.f32.mrf.mxu0 }
 0x17e   : > { %v4911_v48 = vpop.f32.mrf.mxu1 }
 0x17f   : > { %7033 = vst [vmem:[#allocation28_spill] sm:$0xff] %v6516_v21  ;;  %v6521_v33 = vadd.f32 %v2045_v5, %v1694_v20  ;;  %v6523_v53 = vpop.f32.mrf.mxu0 }
 0x180   : > { %v2285_v10 = vpop.f32.mrf.mxu1 }
 0x181   : > { %7034 = vst [vmem:[#allocation29_spill] sm:$0xff] %v6521_v33  ;;  %v6527_v39 = vpop.f32.mrf.mxu0 }
 0x182   : > { %v6525_v3 = vpop.f32.mrf.mxu1 }
 0x183   : > { %v6531_v9 = vpop.f32.mrf.mxu0 }
 0x184   : > { %v6529_v24 = vpop.f32.mrf.mxu1 }
 0x185   : > { %v6535_v15 = vpop.f32.mrf.mxu0 }
 0x186   : > { %v6533_v26 = vpop.f32.mrf.mxu1 }
 0x187   : > { %v6539_v7 = vpop.f32.mrf.mxu0 }
 0x188   : > { %v6537_v18 = vpop.f32.mrf.mxu1 }
 0x189   : > { %v6543_v41 = vpop.f32.mrf.mxu0 }
 0x18a   : > { %v6541_v63 = vpop.f32.mrf.mxu1 }
 0x18b   : > { %v6547_v36 = vpop.f32.mrf.mxu0 }
 0x18c   : > { %v6545_v61 = vpop.f32.mrf.mxu1 }
 0x18d   : > { %v6551_v12 = vpop.f32.mrf.mxu0 }
 0x18e   : > { %v6549_v22 = vpop.f32.mrf.mxu1 }
 0x18f   : > { %v6555_v59 = vpop.f32.mrf.mxu0 }
 0x190   : > { %v6553_v50 = vpop.f32.mrf.mxu1 }
 0x191   : > { %v6559_v45 = vpop.f32.mrf.mxu0 }
 0x192   : > { %v6557_v13 = vpop.f32.mrf.mxu1 }
 0x193   : > { %v6563_v40 = vpop.f32.mrf.mxu0 }
 0x194   : > { %v6561_v25 = vpop.f32.mrf.mxu1 }
 0x195   : > { %v6567_v4 = vpop.f32.mrf.mxu0 }
 0x196   : > { %v6565_v31 = vpop.f32.mrf.mxu1 }
 0x197   : > { %v6571_v0 = vpop.f32.mrf.mxu0 }
 0x198   : > { %v6569_v19 = vpop.f32.mrf.mxu1 }
 0x199   : > { %v6575_v43 = vpop.f32.mrf.mxu0 }
 0x19a   : > { %v6573_v2 = vpop.f32.mrf.mxu1 }
 0x19b   : > { %v6579_v20 = vpop.f32.mrf.mxu0 }
 0x19c   : > { %v6577_v5 = vpop.f32.mrf.mxu1 }
 0x19d   : > { %v6583_v21 = vpop.f32.mrf.mxu0 }
 0x19e   : > { %v6581_v33 = vpop.f32.mrf.mxu1 }
 0x19f   : > { %v6587_v6 = vpop.f32.mrf.mxu0 }
 0x1a0   : > { %v6585_v57 = vpop.f32.mrf.mxu1  ;;  %7035 = vst [vmem:[#allocation30_spill] sm:$0xff] %v6587_v6 }
 0x1a1   : > { %v6591_v29 = vpop.f32.mrf.mxu0 }
 0x1a2   : > { %v6589_v16 = vpop.f32.mrf.mxu1  ;;  %7037 = vst [vmem:[#allocation32_spill] sm:$0xff] %v6591_v29 }
 0x1a3   : > { %7036 = vst [vmem:[#allocation31_spill] sm:$0xff] %v6589_v16  ;;  %v6595_v56 = vpop.f32.mrf.mxu0 }
 0x1a4   : > { %v6593_v37 = vpop.f32.mrf.mxu1  ;;  %7039 = vst [vmem:[#allocation35_spill] sm:$0xff] %v6595_v56 }
 0x1a5   : > { %7038 = vst [vmem:[#allocation34_spill] sm:$0xff] %v6593_v37  ;;  %v6599_v34 = vpop.f32.mrf.mxu0 }
 0x1a6   : > { %v6597_v58 = vpop.f32.mrf.mxu1  ;;  %7041 = vst [vmem:[#allocation6_spill] sm:$0xff] %v6599_v34 }
 0x1a7   : > { %7040 = vst [vmem:[#allocation33_spill] sm:$0xff] %v6597_v58  ;;  %v6603_v49 = vpop.f32.mrf.mxu0 }
 0x1a8   : > { %v6601_v62 = vpop.f32.mrf.mxu1  ;;  %7043 = vst [vmem:[#allocation8_spill] sm:$0xff] %v6603_v49 }
 0x1a9   : > { %7042 = vst [vmem:[#allocation7_spill] sm:$0xff] %v6601_v62  ;;  %v6607_v52 = vpop.f32.mrf.mxu0 }
 0x1aa   : > { %v6605_v47 = vpop.f32.mrf.mxu1  ;;  %7044 = vst [vmem:[#allocation36_spill] sm:$0xff] %v6607_v52 }
 0x1ab   : > { %v6611_v16 = vpop.f32.mrf.mxu0 }
 0x1ac   : > { %v6609_v6 = vpop.f32.mrf.mxu1  ;;  %7046 = vst [vmem:[#allocation9_spill] sm:$0xff] %v6611_v16 }
 0x1ad   : > { %7045 = vst [vmem:[#allocation10_spill] sm:$0xff] %v6609_v6  ;;  %v6615_v37 = vpop.f32.mrf.mxu0 }
 0x1ae   : > { %v6613_v29 = vpop.f32.mrf.mxu1  ;;  %7048 = vst [vmem:[#allocation12_spill] sm:$0xff] %v6615_v37 }
 0x1af   : > { %7047 = vst [vmem:[#allocation5_spill] sm:$0xff] %v6613_v29  ;;  %v6619_v58 = vpop.f32.mrf.mxu0 }
 0x1b0   : > { %v6617_v56 = vpop.f32.mrf.mxu1  ;;  %7050 = vst [vmem:[#allocation13_spill] sm:$0xff] %v6619_v58 }
 0x1b1   : > { %7049 = vst [vmem:[#allocation11_spill] sm:$0xff] %v6617_v56  ;;  %v6623_v62 = vpop.f32.mrf.mxu0  ;;  %v2445_v56 = vadd.f32 %v4911_v48, %v6426_v32  ;;  %v2446_v48 = vadd.f32 %v6529_v24, %v6435_v46  ;;  %v2448_v46 = vadd.f32 %v6537_v18, %v6441_v8 }
 0x1b2   : > { %v6621_v34 = vpop.f32.mrf.mxu1  ;;  %7052 = vst [vmem:[#allocation15_spill] sm:$0xff] %v6623_v62  ;;  %v2444_v62 = vadd.f32 %v2285_v10, %v6429_v11  ;;  %v2449_v11 = vadd.f32 %v6533_v26, %v6438_v28  ;;  %v6659_v10 = vld [vmem:[%s6871_s2] ss:$0 sm:$0xff] }
 0x1b3   : > { %7051 = vst [vmem:[#allocation14_spill] sm:$0xff] %v6621_v34  ;;  %v6627_v52 = vpop.f32.mrf.mxu0  ;;  %v2837_v28 = vadd.f32 %v6531_v9, %v2446_v48  ;;  %v2839_v18 = vadd.f32 %v6539_v7, %v2448_v46  ;;  %v2450_v9 = vadd.f32 %v6545_v61, %v6447_v30  ;;  %v2453_v7 = vadd.f32 %v6549_v22, %v6450_v17 }
 0x1b4   : > { %v6625_v49 = vpop.f32.mrf.mxu1  ;;  %7054 = vst [vmem:[#allocation38_spill] sm:$0xff] %v6627_v52  ;;  %v2835_v32 = vadd.f32 %v6523_v53, %v2444_v62 }
 0x1b5   : > { %7053 = vst [vmem:[#allocation37_spill] sm:$0xff] %v6625_v49  ;;  %v6631_v16 = vpop.f32.mrf.mxu0 }
 0x1b6   : > { %v6629_v6 = vpop.f32.mrf.mxu1  ;;  %7056 = vst [vmem:[#allocation40_spill] sm:$0xff] %v6631_v16  ;;  %v2447_v16 = vadd.f32 %v6525_v3, %v6432_v23 }
 0x1b7   : > { %7055 = vst [vmem:[#allocation39_spill] sm:$0xff] %v6629_v6  ;;  %v6635_v37 = vpop.f32.mrf.mxu0  ;;  %v2836_v6 = vadd.f32 %v6519_v35, %v2445_v56 }
 0x1b8   : > { %v6633_v29 = vpop.f32.mrf.mxu1  ;;  %7058 = vst [vmem:[#allocation42_spill] sm:$0xff] %v6635_v37  ;;  %v2838_v23 = vadd.f32 %v6527_v39, %v2447_v16  ;;  %v2451_v16 = vadd.f32 %v6541_v63, %v6444_v27 }
 0x1b9   : > { %7057 = vst [vmem:[#allocation41_spill] sm:$0xff] %v6633_v29  ;;  %v6640_v34 = vpop.f32.mrf.mxu0 }
 0x1ba   : > { %v6638_v58 = vpop.f32.mrf.mxu1  ;;  %7059 = vst [vmem:[#allocation43_spill] sm:$0xff] %v6640_v34 }
 0x1bb   : > { %v6645_v52 = vpop.f32.mrf.mxu0 }
 0x1bc   : > { %v6643_v49 = vpop.f32.mrf.mxu1  ;;  %7061 = vst [vmem:[#allocation45_spill] sm:$0xff] %v6645_v52  ;;  %v2840_v52 = vadd.f32 %v6535_v15, %v2449_v11 }
 0x1bd   : > { %7060 = vst [vmem:[#allocation44_spill] sm:$0xff] %v6643_v49  ;;  %v5061_v37 = vpop.f32.mrf.mxu0 }
 0x1be   : > { %v5011_v29 = vpop.f32.mrf.mxu1 }
 0x1bf   : > { %v3226_v34 = vadd.f32 %v5011_v29, %v2836_v6  ;;  %v3456_v35 = vpop.f32.mrf.mxu0 }
 0x1c0   : > { %v3066_v56 = vpop.f32.mrf.mxu1 }
 0x1c1   : > { %v3616_v3 = vadd.f32 %v5061_v37, %v3226_v34  ;;  %v3225_v62 = vadd.f32 %v3066_v56, %v2835_v32  ;;  %v5064_v6 = vpop.f32.mrf.mxu0 }
 0x1c2   : > { %v5014_v29 = vpop.f32.mrf.mxu1 }
 0x1c3   : > { %v3655_v53 = vadd.f32 %v6659_v10, %v3616_v3  ;;  %v3615_v24 = vadd.f32 %v3456_v35, %v3225_v62  ;;  %v3228_v26 = vadd.f32 %v5014_v29, %v2838_v23  ;;  %v3466_v49 = vpop.f32.mrf.mxu0  ;;  %v2842_v35 = vadd.f32 %v6543_v41, %v2451_v16 }
 0x1c4   : > { %v3076_v39 = vpop.f32.mrf.mxu1  ;;  %v2841_v29 = vadd.f32 %v6547_v36, %v2450_v9 }
 0x1c5   : > { %v3687_v34 = vmax.f32 %v3655_v53, 0.0  ;;  %v3654_v37 = vadd.f32 %v6659_v10, %v3615_v24  ;;  %v3618_v32 = vadd.f32 %v5064_v6, %v3228_v26  ;;  %v3227_v8 = vadd.f32 %v3076_v39, %v2837_v28  ;;  %v5067_v56 = vpop.f32.mrf.mxu0 }
 0x1c6   : > { %v5017_v48 = vpop.f32.mrf.mxu1  ;;  %v2844_v53 = vadd.f32 %v6551_v12, %v2453_v7  ;;  %v2455_v24 = vadd.f32 %v6557_v13, %v6456_v14 }
 0x1c7   : > { %3719 = vst [vmem:[%s6675_s9 + $0x8] sm:$0xff] %v3687_v34  ;;  %v3686_v27 = vmax.f32 %v3654_v37, 0.0  ;;  %v3657_v15 = vadd.f32 %v6659_v10, %v3618_v32  ;;  %v3617_v63 = vadd.f32 %v3466_v49, %v3227_v8  ;;  %v3230_v11 = vadd.f32 %v5017_v48, %v2840_v52  ;;  %v3476_v30 = vpop.f32.mrf.mxu0 }
 0x1c8   : > { %v3086_v23 = vpop.f32.mrf.mxu1  ;;  %v2452_v49 = vadd.f32 %v6553_v50, %v6453_v55  ;;  %v2454_v37 = vadd.f32 %v6561_v25, %v6459_v51  ;;  %v2846_v9 = vadd.f32 %v6559_v45, %v2455_v24  ;;  %v2457_v48 = vadd.f32 %v6565_v31, %v6462_v60 }
 0x1c9   : > { %3718 = vst [vmem:[%s6675_s9] sm:$0xff] %v3686_v27  ;;  %v3689_v61 = vmax.f32 %v3657_v15, 0.0  ;;  %v3656_v3 = vadd.f32 %v6659_v10, %v3617_v63  ;;  %v3620_v62 = vadd.f32 %v5067_v56, %v3230_v11  ;;  %v3229_v46 = vadd.f32 %v3086_v23, %v2839_v18  ;;  %v5070_v6 = vpop.f32.mrf.mxu0 }
 0x1ca   : > { %v5020_v52 = vpop.f32.mrf.mxu1  ;;  %v2843_v34 = vadd.f32 %v6555_v59, %v2452_v49  ;;  %v2845_v63 = vadd.f32 %v6563_v40, %v2454_v37  ;;  %v2456_v11 = vadd.f32 %v6569_v19, %v6465_v42  ;;  %v2458_v49 = vadd.f32 %v6577_v5, %v6471_v38  ;;  %v7063_v37 = vld [vmem:[#allocation31_spill] sm:$0xff] }
 0x1cb   : > { %3721 = vst [vmem:[%s6675_s9 + $0x18] sm:$0xff] %v3689_v61  ;;  %v3688_v41 = vmax.f32 %v3656_v3, 0.0  ;;  %v3659_v17 = vadd.f32 %v6659_v10, %v3620_v62  ;;  %v3619_v22 = vadd.f32 %v3476_v30, %v3229_v46  ;;  %v3232_v28 = vadd.f32 %v5020_v52, %v2842_v35  ;;  %v3486_v16 = vpop.f32.mrf.mxu0 }
 0x1cc   : > { %v3096_v26 = vpop.f32.mrf.mxu1  ;;  %v2848_v30 = vadd.f32 %v6567_v4, %v2457_v48  ;;  %v2459_v61 = vadd.f32 %v6573_v2, %v6468_v1  ;;  %v7066_v48 = vld [vmem:[#allocation34_spill] sm:$0xff] }
 0x1cd   : > { %3720 = vst [vmem:[%s6675_s9 + $0x10] sm:$0xff] %v3688_v41  ;;  %v3691_v36 = vmax.f32 %v3659_v17, 0.0  ;;  %v3658_v55 = vadd.f32 %v6659_v10, %v3619_v22  ;;  %v3622_v50 = vadd.f32 %v5070_v6, %v3232_v28  ;;  %v3231_v39 = vadd.f32 %v3096_v26, %v2841_v29  ;;  %v5073_v8 = vpop.f32.mrf.mxu0 }
 0x1ce   : > { %v5023_v32 = vpop.f32.mrf.mxu1  ;;  %v2847_v29 = vadd.f32 %v6571_v0, %v2456_v11  ;;  %v2850_v17 = vadd.f32 %v6575_v43, %v2459_v61  ;;  %v2461_v22 = vadd.f32 %v6581_v33, %v6474_v54  ;;  %v2849_v26 = vadd.f32 %v6579_v20, %v2458_v49 }
 0x1cf   : > { %3723 = vst [vmem:[%s6675_s9 + $0x28] sm:$0xff] %v3691_v36  ;;  %v3690_v12 = vmax.f32 %v3658_v55, 0.0  ;;  %v3661_v14 = vadd.f32 %v6659_v10, %v3622_v50  ;;  %v3621_v13 = vadd.f32 %v3486_v16, %v3231_v39  ;;  %v3234_v18 = vadd.f32 %v5023_v32, %v2844_v53  ;;  %v3496_v27 = vpop.f32.mrf.mxu0 }
 0x1d0   : > { %v3106_v56 = vpop.f32.mrf.mxu1  ;;  %v2460_v16 = vadd.f32 %v6585_v57, %v6477_v44  ;;  %v2852_v39 = vadd.f32 %v6583_v21, %v2461_v22 }
 0x1d1   : > { %3722 = vst [vmem:[%s6675_s9 + $0x20] sm:$0xff] %v3690_v12  ;;  %v3693_v59 = vmax.f32 %v3661_v14, 0.0  ;;  %v3660_v51 = vadd.f32 %v6659_v10, %v3621_v13  ;;  %v3624_v25 = vadd.f32 %v5073_v8, %v3234_v18  ;;  %v3233_v15 = vadd.f32 %v3106_v56, %v2843_v34  ;;  %v5076_v7 = vpop.f32.mrf.mxu0  ;;  %v7062_v34 = vld [vmem:[#allocation16_spill] sm:$0xff]  ;;  %v7064_v13 = vld [vmem:[#allocation30_spill] sm:$0xff] }
 0x1d2   : > { %v5026_v35 = vpop.f32.mrf.mxu1  ;;  %v2463_v32 = vadd.f32 %v7063_v37, %v7062_v34  ;;  %v2851_v18 = vadd.f32 %v7064_v13, %v2460_v16  ;;  %v7078_v37 = vld [vmem:[#allocation36_spill] sm:$0xff] }
 0x1d3   : > { %3725 = vst [vmem:[%s6675_s9 + $0x38] sm:$0xff] %v3693_v59  ;;  %v3692_v45 = vmax.f32 %v3660_v51, 0.0  ;;  %v3663_v60 = vadd.f32 %v6659_v10, %v3624_v25  ;;  %v3623_v31 = vadd.f32 %v3496_v27, %v3233_v15  ;;  %v3236_v23 = vadd.f32 %v5026_v35, %v2846_v9  ;;  %v3506_v62 = vpop.f32.mrf.mxu0  ;;  %v7065_v9 = vld [vmem:[#allocation17_spill] sm:$0xff]  ;;  %v7068_v35 = vld [vmem:[#allocation18_spill] sm:$0xff] }
 0x1d4   : > { %v3116_v3 = vpop.f32.mrf.mxu1  ;;  %v2462_v56 = vadd.f32 %v7066_v48, %v7065_v9  ;;  %v7081_v48 = vld [vmem:[#allocation9_spill] sm:$0xff] }
 0x1d5   : > { %3724 = vst [vmem:[%s6675_s9 + $0x30] sm:$0xff] %v3692_v45  ;;  %v3695_v40 = vmax.f32 %v3663_v60, 0.0  ;;  %v3662_v42 = vadd.f32 %v6659_v10, %v3623_v31  ;;  %v3626_v19 = vadd.f32 %v5076_v7, %v3236_v23  ;;  %v3235_v46 = vadd.f32 %v3116_v3, %v2845_v63  ;;  %v5079_v6 = vpop.f32.mrf.mxu0  ;;  %v7067_v63 = vld [vmem:[#allocation32_spill] sm:$0xff]  ;;  %v7069_v7 = vld [vmem:[#allocation33_spill] sm:$0xff] }
 0x1d6   : > { %v5029_v52 = vpop.f32.mrf.mxu1  ;;  %v2854_v11 = vadd.f32 %v7067_v63, %v2463_v32  ;;  %v2465_v45 = vadd.f32 %v7069_v7, %v7068_v35  ;;  %v7084_v7 = vld [vmem:[#allocation12_spill] sm:$0xff] }
 0x1d7   : > { %3727 = vst [vmem:[%s6675_s9 + $0x48] sm:$0xff] %v3695_v40  ;;  %v3694_v4 = vmax.f32 %v3662_v42, 0.0  ;;  %v3665_v1 = vadd.f32 %v6659_v10, %v3626_v19  ;;  %v3625_v2 = vadd.f32 %v3506_v62, %v3235_v46  ;;  %v3238_v41 = vadd.f32 %v5029_v52, %v2848_v30  ;;  %v3516_v53 = vpop.f32.mrf.mxu0  ;;  %v7070_v62 = vld [vmem:[#allocation35_spill] sm:$0xff] }
 0x1d8   : > { %v3126_v28 = vpop.f32.mrf.mxu1  ;;  %v2853_v40 = vadd.f32 %v7070_v62, %v2462_v56  ;;  %v7071_v42 = vld [vmem:[#allocation19_spill] sm:$0xff] }
 0x1d9   : > { %3726 = vst [vmem:[%s6675_s9 + $0x40] sm:$0xff] %v3694_v4  ;;  %v3697_v0 = vmax.f32 %v3665_v1, 0.0  ;;  %v3664_v38 = vadd.f32 %v6659_v10, %v3625_v2  ;;  %v3628_v5 = vadd.f32 %v5079_v6, %v3238_v41  ;;  %v3237_v24 = vadd.f32 %v3126_v28, %v2847_v29  ;;  %v5082_v55 = vpop.f32.mrf.mxu0  ;;  %v7072_v19 = vld [vmem:[#allocation7_spill] sm:$0xff]  ;;  %v7073_v2 = vld [vmem:[#allocation6_spill] sm:$0xff] }
 0x1da   : > { %v5032_v36 = vpop.f32.mrf.mxu1  ;;  %v2464_v46 = vadd.f32 %v7072_v19, %v7071_v42  ;;  %v2856_v41 = vadd.f32 %v7073_v2, %v2465_v45  ;;  %v7087_v19 = vld [vmem:[#allocation13_spill] sm:$0xff] }
 0x1db   : > { %3729 = vst [vmem:[%s6675_s9 + $0x58] sm:$0xff] %v3697_v0  ;;  %v3696_v43 = vmax.f32 %v3664_v38, 0.0  ;;  %v3667_v54 = vadd.f32 %v6659_v10, %v3628_v5  ;;  %v3627_v33 = vadd.f32 %v3516_v53, %v3237_v24  ;;  %v3240_v50 = vadd.f32 %v5032_v36, %v2850_v17  ;;  %v3526_v12 = vpop.f32.mrf.mxu0  ;;  %v7074_v17 = vld [vmem:[#allocation20_spill] sm:$0xff]  ;;  %v7076_v36 = vld [vmem:[#allocation21_spill] sm:$0xff] }
 0x1dc   : > { %v3136_v8 = vpop.f32.mrf.mxu1  ;;  %v2467_v22 = vadd.f32 %v6605_v47, %v7074_v17 }
 0x1dd   : > { %3728 = vst [vmem:[%s6675_s9 + $0x50] sm:$0xff] %v3696_v43  ;;  %v3699_v20 = vmax.f32 %v3667_v54, 0.0  ;;  %v3666_v44 = vadd.f32 %v6659_v10, %v3627_v33  ;;  %v3630_v57 = vadd.f32 %v5082_v55, %v3240_v50  ;;  %v3239_v14 = vadd.f32 %v3136_v8, %v2849_v26  ;;  %v5085_v59 = vpop.f32.mrf.mxu0  ;;  %v7075_v26 = vld [vmem:[#allocation8_spill] sm:$0xff]  ;;  %v7077_v55 = vld [vmem:[#allocation10_spill] sm:$0xff] }
 0x1de   : > { %v5035_v27 = vpop.f32.mrf.mxu1  ;;  %v2855_v16 = vadd.f32 %v7075_v26, %v2464_v46  ;;  %v2466_v43 = vadd.f32 %v7077_v55, %v7076_v36  ;;  %v2858_v32 = vadd.f32 %v7078_v37, %v2467_v22  ;;  %v7079_v8 = vld [vmem:[#allocation22_spill] sm:$0xff]  ;;  %v7090_v22 = vld [vmem:[#allocation15_spill] sm:$0xff] }
 0x1df   : > { %3731 = vst [vmem:[%s6675_s9 + $0x68] sm:$0xff] %v3699_v20  ;;  %v3698_v21 = vmax.f32 %v3666_v44, 0.0  ;;  %v3669_v51 = vadd.f32 %v6659_v10, %v3630_v57  ;;  %v3629_v25 = vadd.f32 %v3526_v12, %v3239_v14  ;;  %v3242_v15 = vadd.f32 %v5035_v27, %v2852_v39  ;;  %v3536_v31 = vpop.f32.mrf.mxu0  ;;  %v7080_v12 = vld [vmem:[#allocation5_spill] sm:$0xff]  ;;  %v7082_v27 = vld [vmem:[#allocation23_spill] sm:$0xff] }
 0x1e0   : > { %v3146_v60 = vpop.f32.mrf.mxu1  ;;  %v2469_v20 = vadd.f32 %v7080_v12, %v7079_v8  ;;  %v2857_v56 = vadd.f32 %v7081_v48, %v2466_v43  ;;  %v7093_v43 = vld [vmem:[#allocation38_spill] sm:$0xff] }
 0x1e1   : > { %3730 = vst [vmem:[%s6675_s9 + $0x60] sm:$0xff] %v3698_v21  ;;  %v3701_v23 = vmax.f32 %v3669_v51, 0.0  ;;  %v3668_v30 = vadd.f32 %v6659_v10, %v3629_v25  ;;  %v3632_v61 = vadd.f32 %v5085_v59, %v3242_v15  ;;  %v3241_v3 = vadd.f32 %v3146_v60, %v2851_v18  ;;  %v5088_v49 = vpop.f32.mrf.mxu0  ;;  %v7083_v59 = vld [vmem:[#allocation11_spill] sm:$0xff]  ;;  %v7085_v60 = vld [vmem:[#allocation24_spill] sm:$0xff] }
 0x1e2   : > { %v5038_v29 = vpop.f32.mrf.mxu1  ;;  %v2468_v21 = vadd.f32 %v7083_v59, %v7082_v27  ;;  %v2860_v45 = vadd.f32 %v7084_v7, %v2469_v20  ;;  %v7096_v20 = vld [vmem:[#allocation40_spill] sm:$0xff]  ;;  %v7098_v59 = vld [vmem:[#allocation42_spill] sm:$0xff] }
 0x1e3   : > { %3733 = vst [vmem:[%s6675_s9 + $0x78] sm:$0xff] %v3701_v23  ;;  %v3700_v52 = vmax.f32 %v3668_v30, 0.0  ;;  %v3671_v6 = vadd.f32 %v6659_v10, %v3632_v61  ;;  %v3631_v4 = vadd.f32 %v3536_v31, %v3241_v3  ;;  %v3244_v1 = vadd.f32 %v5038_v29, %v2854_v11  ;;  %v3546_v53 = vpop.f32.mrf.mxu0  ;;  %v7086_v31 = vld [vmem:[#allocation14_spill] sm:$0xff]  ;;  %v7088_v29 = vld [vmem:[#allocation25_spill] sm:$0xff] }
 0x1e4   : > { %v3156_v28 = vpop.f32.mrf.mxu1  ;;  %v2471_v23 = vadd.f32 %v7086_v31, %v7085_v60  ;;  %v2859_v46 = vadd.f32 %v7087_v19, %v2468_v21  ;;  %v7101_v60 = vld [vmem:[#allocation43_spill] sm:$0xff] }
 0x1e5   : > { %3732 = vst [vmem:[%s6675_s9 + $0x70] sm:$0xff] %v3700_v52  ;;  %v3703_v0 = vmax.f32 %v3671_v6, 0.0  ;;  %v3670_v38 = vadd.f32 %v6659_v10, %v3631_v4  ;;  %v3634_v5 = vadd.f32 %v5088_v49, %v3244_v1  ;;  %v3243_v24 = vadd.f32 %v3156_v28, %v2853_v40  ;;  %v5091_v33 = vpop.f32.mrf.mxu0  ;;  %v7089_v49 = vld [vmem:[#allocation37_spill] sm:$0xff] }
 0x1e6   : > { %v5041_v54 = vpop.f32.mrf.mxu1  ;;  %v2470_v52 = vadd.f32 %v7089_v49, %v7088_v29  ;;  %v2862_v28 = vadd.f32 %v7090_v22, %v2471_v23 }
 0x1e7   : > { %3735 = vst [vmem:[%s6675_s9 + $0x88] sm:$0xff] %v3703_v0  ;;  %v3702_v50 = vmax.f32 %v3670_v38, 0.0  ;;  %v3673_v47 = vadd.f32 %v6659_v10, %v3634_v5  ;;  %v3633_v39 = vadd.f32 %v3546_v53, %v3243_v24  ;;  %v3246_v34 = vadd.f32 %v5041_v54, %v2856_v41  ;;  %v3556_v57 = vpop.f32.mrf.mxu0  ;;  %v7091_v53 = vld [vmem:[#allocation26_spill] sm:$0xff]  ;;  %v7092_v0 = vld [vmem:[#allocation39_spill] sm:$0xff] }
 0x1e8   : > { %v3166_v44 = vpop.f32.mrf.mxu1  ;;  %v2473_v38 = vadd.f32 %v7092_v0, %v7091_v53  ;;  %v2861_v54 = vadd.f32 %v7093_v43, %v2470_v52 }
 0x1e9   : > { %3734 = vst [vmem:[%s6675_s9 + $0x80] sm:$0xff] %v3702_v50  ;;  %v3705_v14 = vmax.f32 %v3673_v47, 0.0  ;;  %v3672_v13 = vadd.f32 %v6659_v10, %v3633_v39  ;;  %v3636_v18 = vadd.f32 %v5091_v33, %v3246_v34  ;;  %v3245_v9 = vadd.f32 %v3166_v44, %v2855_v16  ;;  %v5094_v25 = vpop.f32.mrf.mxu0  ;;  %v7094_v33 = vld [vmem:[#allocation27_spill] sm:$0xff]  ;;  %v7095_v50 = vld [vmem:[#allocation41_spill] sm:$0xff] }
 0x1ea   : > { %v5044_v51 = vpop.f32.mrf.mxu1  ;;  %v2472_v47 = vadd.f32 %v7095_v50, %v7094_v33  ;;  %v2864_v44 = vadd.f32 %v7096_v20, %v2473_v38 }
 0x1eb   : > { %3737 = vst [vmem:[%s6675_s9 + $0x98] sm:$0xff] %v3705_v14  ;;  %v3704_v15 = vmax.f32 %v3672_v13, 0.0  ;;  %v3675_v63 = vadd.f32 %v6659_v10, %v3636_v18  ;;  %v3635_v11 = vadd.f32 %v3556_v57, %v3245_v9  ;;  %v3248_v35 = vadd.f32 %v5044_v51, %v2858_v32  ;;  %v3566_v61 = vpop.f32.mrf.mxu0  ;;  %v7097_v57 = vld [vmem:[#allocation28_spill] sm:$0xff]  ;;  %v7099_v51 = vld [vmem:[#allocation29_spill] sm:$0xff] }
 0x1ec   : > { %v3176_v30 = vpop.f32.mrf.mxu1  ;;  %v2475_v14 = vadd.f32 %v6638_v58, %v7097_v57  ;;  %v2863_v21 = vadd.f32 %v7098_v59, %v2472_v47 }
 0x1ed   : > { %3736 = vst [vmem:[%s6675_s9 + $0x90] sm:$0xff] %v3704_v15  ;;  %v3707_v3 = vmax.f32 %v3675_v63, 0.0  ;;  %v3674_v62 = vadd.f32 %v6659_v10, %v3635_v11  ;;  %v3638_v40 = vadd.f32 %v5094_v25, %v3248_v35  ;;  %v3247_v42 = vadd.f32 %v3176_v30, %v2857_v56  ;;  %v5097_v4 = vpop.f32.mrf.mxu0  ;;  %v7100_v25 = vld [vmem:[#allocation44_spill] sm:$0xff] }
 0x1ee   : > { %v5047_v6 = vpop.f32.mrf.mxu1  ;;  %v2474_v15 = vadd.f32 %v7100_v25, %v7099_v51  ;;  %v2866_v31 = vadd.f32 %v7101_v60, %v2475_v14 }
 0x1ef   : > { %3739 = vst [vmem:[%s6675_s9 + $0xa8] sm:$0xff] %v3707_v3  ;;  %v3706_v1 = vmax.f32 %v3674_v62, 0.0  ;;  %v3677_v2 = vadd.f32 %v6659_v10, %v3638_v40  ;;  %v3637_v41 = vadd.f32 %v3566_v61, %v3247_v42  ;;  %v3250_v17 = vadd.f32 %v5047_v6, %v2860_v45  ;;  %v3576_v24 = vpop.f32.mrf.mxu0  ;;  %v7102_v42 = vld [vmem:[#allocation45_spill] sm:$0xff] }
 0x1f0   : > { %v3186_v5 = vpop.f32.mrf.mxu1  ;;  %v2865_v19 = vadd.f32 %v7102_v42, %v2474_v15 }
 0x1f1   : > { %3738 = vst [vmem:[%s6675_s9 + $0xa0] sm:$0xff] %v3706_v1  ;;  %v3709_v26 = vmax.f32 %v3677_v2, 0.0  ;;  %v3676_v16 = vadd.f32 %v6659_v10, %v3637_v41  ;;  %v3640_v36 = vadd.f32 %v5097_v4, %v3250_v17  ;;  %v3249_v55 = vadd.f32 %v3186_v5, %v2859_v46  ;;  %v5100_v34 = vpop.f32.mrf.mxu0 }
 0x1f2   : > { %v5050_v39 = vpop.f32.mrf.mxu1 }
 0x1f3   : > { %3741 = vst [vmem:[%s6675_s9 + $0xb8] sm:$0xff] %v3709_v26  ;;  %v3708_v37 = vmax.f32 %v3676_v16, 0.0  ;;  %v3679_v32 = vadd.f32 %v6659_v10, %v3640_v36  ;;  %v3639_v8 = vadd.f32 %v3576_v24, %v3249_v55  ;;  %v3252_v12 = vadd.f32 %v5050_v39, %v2862_v28  ;;  %v3586_v18 = vpop.f32.mrf.mxu0 }
 0x1f4   : > { %v3196_v13 = vpop.f32.mrf.mxu1 }
 0x1f5   : > { %3740 = vst [vmem:[%s6675_s9 + $0xb0] sm:$0xff] %v3708_v37  ;;  %v3711_v9 = vmax.f32 %v3679_v32, 0.0  ;;  %v3678_v48 = vadd.f32 %v6659_v10, %v3639_v8  ;;  %v3642_v56 = vadd.f32 %v5100_v34, %v3252_v12  ;;  %v3251_v27 = vadd.f32 %v3196_v13, %v2861_v54  ;;  %v5103_v11 = vpop.f32.mrf.mxu0 }
 0x1f6   : > { %v5053_v63 = vpop.f32.mrf.mxu1 }
 0x1f7   : > { %3743 = vst [vmem:[%s6675_s9 + $0xc8] sm:$0xff] %v3711_v9  ;;  %v3710_v35 = vmax.f32 %v3678_v48, 0.0  ;;  %v3681_v58 = vadd.f32 %v6659_v10, %v3642_v56  ;;  %v3641_v7 = vadd.f32 %v3586_v18, %v3251_v27  ;;  %v3254_v45 = vadd.f32 %v5053_v63, %v2864_v44  ;;  %v3596_v30 = vpop.f32.mrf.mxu0 }
 0x1f8   : > { %v3206_v23 = vpop.f32.mrf.mxu1 }
 0x1f9   : > { %3742 = vst [vmem:[%s6675_s9 + $0xc0] sm:$0xff] %v3710_v35  ;;  %v3713_v61 = vmax.f32 %v3681_v58, 0.0  ;;  %v3680_v3 = vadd.f32 %v6659_v10, %v3641_v7  ;;  %v3644_v62 = vadd.f32 %v5103_v11, %v3254_v45  ;;  %v3253_v40 = vadd.f32 %v3206_v23, %v2863_v21  ;;  %v5106_v29 = vpop.f32.mrf.mxu0 }
 0x1fa   : > { %v5056_v46 = vpop.f32.mrf.mxu1 }
 0x1fb   : > { %3745 = vst [vmem:[%s6675_s9 + $0xd8] sm:$0xff] %v3713_v61  ;;  %v3712_v49 = vmax.f32 %v3680_v3, 0.0  ;;  %v3683_v52 = vadd.f32 %v6659_v10, %v3644_v62  ;;  %v3643_v6 = vadd.f32 %v3596_v30, %v3253_v40  ;;  %v3256_v4 = vadd.f32 %v5056_v46, %v2866_v31  ;;  %v3606_v28 = vpop.f32.mrf.mxu0 }
 0x1fc   : > { %v3216_v1 = vpop.f32.mrf.mxu1 }
 0x1fd   : > { %3744 = vst [vmem:[%s6675_s9 + $0xd0] sm:$0xff] %v3712_v49  ;;  %v3715_v2 = vmax.f32 %v3683_v52, 0.0  ;;  %v3682_v41 = vadd.f32 %v6659_v10, %v3643_v6  ;;  %v3646_v17 = vadd.f32 %v5106_v29, %v3256_v4  ;;  %v3255_v22 = vadd.f32 %v3216_v1, %v2865_v19 }
 0x1ff   : > { %3747 = vst [vmem:[%s6675_s9 + $0xe8] sm:$0xff] %v3715_v2  ;;  %v3714_v53 = vmax.f32 %v3682_v41, 0.0  ;;  %v3685_v0 = vadd.f32 %v6659_v10, %v3646_v17  ;;  %v3645_v38 = vadd.f32 %v3606_v28, %v3255_v22 }
 0x201   : > { %3746 = vst [vmem:[%s6675_s9 + $0xe0] sm:$0xff] %v3714_v53  ;;  %v3717_v5 = vmax.f32 %v3685_v0, 0.0  ;;  %v3684_v24 = vadd.f32 %v6659_v10, %v3645_v38 }
 0x203   : > { %3749 = vst [vmem:[%s6675_s9 + $0xf8] sm:$0xff] %v3717_v5  ;;  %v3716_v26 = vmax.f32 %v3684_v24, 0.0 }
 0x205   : > { %3748 = vst [vmem:[%s6675_s9 + $0xf0] sm:$0xff] %v3716_v26 }
 0x206   : > { %5180 = shalt.err (!%p5177_p5)
}
 0x207   : > { %s5181_s29 = scalar_lea.hbm %s6816_s21, 4096  ;;  %s5185_s5 = scalar_lea.hbm %s6872_s3, 8192 }
 0x208   : > { %p5182_p6 = scmp.ne.s32.totalorder %s6816_s21, %s5181_s29  ;;  %p5186_p10 = scmp.lt.s32.totalorder %s6816_s21, %s6872_s3 }
 0x209   : > { %p5187_p11 = scmp.lt.s32.totalorder %s5185_s5, %s5181_s29 }
 0x20a   : > { %p5183_p7 = pnand %p5182_p6, %p5308_p4 }
 0x20b   : > { %p5188_p12 = por %p5187_p11, %p5186_p10 }
 0x20c   : > { %p5184_p9 = pneg %p5183_p7 }
 0x20e   : > { %p5189_p13 = pnand %p5188_p12, %p5184_p9 }
 0x210   : > { %5192 = shalt.err (!%p5189_p13)
}
 0x211   : > { %s5246_s8 = smov 128   ;;  %s5247_s9 = smov 8  }
 0x212   : > { %5110 = dma.vmem_to_hbm [thread:$0]  (%p5308_p4), %s6818_s11, 4096, %s6816_s21, %s6824_s15, %s5246_s8, %s5246_s8, %s5247_s9  }
 0x213 PF: > { %p5116_p0 = scmp.ge.s32.totalorder %s5243_s17, 2  ;;  %s3782_s10 = sand.u32 1, %s5223_s12  }
 0x214   : > { %s3783_s18 = scalar_lea.sflag [#allocation3], %s3782_s10 }
 0x215   : > { %p5113_p1 = pnand %p5116_p0, %p5315_p8 }
 0x217   : > { %p5114_p2 = pneg %p5113_p1 }
 0x219   : > { %5218 = dma.done.wait (%p5114_p2), %s3783_s18, 4096  }
 0x21a   : > { %5220 = vsyncadd (%p5114_p2), %s3783_s18, 4294963200  ;;  %s16_s17 = sadd.s32 1, %s5243_s17   ;;  %s7103_s12 = smov %s5227_s13 }
 0x21b   : > { %p13_p3 = scmp.ge.s32.totalorder %s16_s17, 4   ;;  %s7104_s13 = smov %s5231_s14 }
 0x21c   : > { %s7105_s14 = smov %s5321_s25  ;;  %s7106_s15 = smov %s5239_s16 }
 0x21d   : > { %s7107_s16 = smov %s7109_s20  ;;  %15 = sbr.rel (!%p13_p3) target bundleno = 4 (0x4), region = 77 }
 0x222   :  { %3788 = vsyncpa [#allocation3], 1 }
 0x223   :  { %3790 = vsyncpa [#allocation3 + $0x1], 1 }

</bundles_post_ra>
